<compile_context>
chip_gen: v7x
topology: tpu7x:2x2x1
jax: 0.10.0
libtpu: 0.0.40
codegen_flags: <defaults>
</compile_context>

<pallas_src>
import functools

import jax
import jax.numpy as jnp
from jax.experimental import pallas as pl
from jax.experimental.pallas import tpu as pltpu

F32 = jnp.float32
BF16 = jnp.bfloat16
LANE = 128


# ------------------------------ Pallas kernel --------------------------------

def _conv_bn_relu_kernel(x_ref, w_ref, b_ref, o_ref, *,
                         taps, stride, th, wo, cin, coutp, relu):
    """One (image, output-row-block) grid step.

    x_ref : (1, HQ, s, s, WQ, Cin)  phase-decomposed, zero-padded image (bf16)
    w_ref : (K*K*Cin, Coutp)        conv taps with BN scale folded in (bf16)
    b_ref : (1, Coutp)              folded BN (+conv) bias (f32)
    o_ref : (1, TH, Wo, Coutp)      output tile
    """
    h = pl.program_id(1)
    row0 = pl.multiple_of(h * th, th)

    # Build the im2col LHS for this tile in VMEM: one deep contraction feeds the
    # MXU at full depth (K*K*cin) instead of K*K shallow cin-deep passes.
    slabs = [
        x_ref[0,
              pl.ds(row0 + dy // stride, th),   # output-row -> input-row quotient
              dy % stride,                      # row phase  (static)
              dx % stride,                      # col phase  (static)
              pl.ds(dx // stride, wo),          # col quotient
              :]
        for dy, dx in taps
    ]
    lhs = slabs[0] if len(slabs) == 1 else jnp.concatenate(slabs, axis=-1)
    lhs = lhs.reshape(th * wo, len(taps) * cin)

    y = jnp.dot(lhs, w_ref[...], preferred_element_type=jnp.float32)
    y = y + b_ref[...]                          # BN scale already in the weights
    if relu:
        y = jnp.maximum(y, 0.0)
    o_ref[...] = y.reshape(1, th, wo, coutp).astype(o_ref.dtype)


# -------------------------------- wrapper -------------------------------------

def basic_conv(x_nchw, weight, *, stride=1, padding=0, dilation=1, groups=1,
               bn=None, conv_bias=None, relu=True, eps=1e-5,
               out_dtype=BF16, return_nhwc=False, block_rows=None,
               target_rows=512):
    """BasicConv.forward: Conv2d -> (BatchNorm2d eval) -> (ReLU).

    x_nchw : (B, Cin, H, W) f32 (PyTorch layout).
    weight : (Cout, Cin, K, K) f32 (PyTorch layout).
    bn     : None or (gamma, beta, running_mean, running_var), each (Cout,).
    Inputs/weights are quantized to bf16 for the MXU (f32 accumulation).
    """
    # TODO(synk): grouped convolution (groups > 1) not implemented.
    assert groups == 1
    # TODO(synk): training-mode batch statistics are not reproduced (eval stats).
    B, cin, H, W = x_nchw.shape
    cout, cin_w, kh, kw = weight.shape
    assert cin_w == cin and kh == kw
    K = kh
    s = int(stride)
    span = dilation * (K - 1)

    # Strided output extents (native stride, computed exactly).
    ho = (H + 2 * padding - span - 1) // s + 1
    wo = (W + 2 * padding - span - 1) // s + 1
    assert ho > 0 and wo > 0

    # Row block: fixed size, need not divide ho (cdiv grid + padded reads).
    if block_rows is not None:
        th = max(1, min(int(block_rows), ho))
    else:
        th = max(1, min(ho, max(1, target_rows // max(wo, 1))))
        # v7x megacore: make sure both TensorCores get work when possible.
        while B * pl.cdiv(ho, th) < 2 and th > 1:
            th = pl.cdiv(th, 2)
    nhb = pl.cdiv(ho, th)

    # ---- fold eval-mode BN (+ optional conv bias) into scale / bias ----------
    if bn is not None:
        gamma, beta, mean, var = (a.astype(F32) for a in bn)
        scale = gamma / jnp.sqrt(var + eps)
        bias = beta - mean * scale
    else:
        scale = jnp.ones((cout,), F32)
        bias = jnp.zeros((cout,), F32)
    if conv_bias is not None:
        bias = bias + scale * conv_bias.astype(F32)

    # ---- weights: (Cout,Cin,K,K) -> (K*K*Cin, Coutp), BN scale folded, bf16 --
    kkc = K * K * cin
    w2d = jnp.transpose(weight, (2, 3, 1, 0)).reshape(kkc, cout).astype(F32)
    w2d = w2d * scale[None, :]                 # fold BN scale into the weights
    # Lane-pad cout only when cout >= 128 (small cout: keep masked stores rather
    # than 4x HBM write amplification + an extra XLA slice pass).
    if cout >= LANE and cout % LANE:
        coutp = pl.cdiv(cout, LANE) * LANE
        w2d = jnp.pad(w2d, ((0, 0), (0, coutp - cout)))
        bias = jnp.pad(bias, (0, coutp - cout))
    else:
        coutp = cout
    w2d = w2d.astype(BF16)
    bias = bias.reshape(1, coutp)

    # ---- input: NCHW -> NHWC bf16, zero-pad, phase-decompose for the stride --
    # hq/wq chosen so every (row-block, tap) read is in-bounds even for the last
    # (partial) row block -> no undefined VMEM reads.
    hq = max(pl.cdiv(H + 2 * padding, s), nhb * th + span // s)
    wq = max(pl.cdiv(W + 2 * padding, s), wo + span // s)
    x = jnp.transpose(x_nchw, (0, 2, 3, 1)).astype(BF16)
    x = jnp.pad(x, ((0, 0),
                    (padding, hq * s - H - padding),
                    (padding, wq * s - W - padding),
                    (0, 0)))
    # (B, hq*s, wq*s, Cin) -> (B, hq, s, s, wq, Cin); a no-op when s == 1.
    x = x.reshape(B, hq, s, wq, s, cin).transpose(0, 1, 2, 4, 3, 5)

    taps = tuple((dy * dilation, dx * dilation)
                 for dy in range(K) for dx in range(K))

    # ---- VMEM budget (whole padded image + weights stay resident per batch) --
    # TODO(synk): halo-tile the input with manual make_async_copy double
    # buffering so large images do not require full-image residency.
    vmem_limit = 48 * 1024 * 1024
    est = (2 * hq * s * s * wq * cin * 2                     # 2x bf16 image
           + 2 * kkc * coutp * 2                             # 2x bf16 weights
           + 2 * th * wo * coutp * jnp.dtype(out_dtype).itemsize   # 2x out tile
           + th * wo * (kkc * 2 + coutp * 4))                # im2col + f32 dot out
    assert est <= vmem_limit, (
        f"BasicConv Pallas kernel needs ~{est / 2**20:.1f} MiB VMEM "
        f"(> {vmem_limit / 2**20:.0f} MiB); reduce target_rows / image size or "
        "implement halo-DMA input tiling (see TODO).")

    kern = functools.partial(_conv_bn_relu_kernel, taps=taps, stride=s, th=th,
                             wo=wo, cin=cin, coutp=coutp, relu=relu)
    out = pl.pallas_call(
        kern,
        out_shape=jax.ShapeDtypeStruct((B, ho, wo, coutp), out_dtype),
        grid=(B, nhb),
        in_specs=[
            # Padded image of batch b; constant index across the row-block axis,
            # so Pallas does not re-DMA it per row block.
            pl.BlockSpec((1, hq, s, s, wq, cin),
                         lambda b, h: (b, 0, 0, 0, 0, 0)),
            # Weights / bias: constant index_map -> DMA'd once, stay resident.
            # TODO(synk): pl.Buffered(1) here would halve their VMEM footprint.
            pl.BlockSpec((kkc, coutp), lambda b, h: (0, 0)),
            pl.BlockSpec((1, coutp), lambda b, h: (0, 0)),
        ],
        out_specs=pl.BlockSpec((1, th, wo, coutp), lambda b, h: (b, h, 0, 0)),
        compiler_params=pltpu.CompilerParams(
            dimension_semantics=("parallel", "parallel"),
            vmem_limit_bytes=vmem_limit),
    )(x, w2d, bias)

    if coutp != cout:
        out = out[..., :cout]
    if return_nhwc:
        return out
    return jnp.transpose(out, (0, 3, 1, 2))    # NCHW to match the nn.Module API


# --------------------------- pure-JAX reference --------------------------------

def _basic_conv_ref(x, weight, *, stride, padding, dilation,
                    bn, conv_bias, relu, eps=1e-5):
    # Same bf16-quantized operands as the kernel, so only accumulation order /
    # fold-order and the final bf16 store differ.
    xq = x.astype(BF16).astype(F32)
    wq = weight.astype(BF16).astype(F32)
    y = jax.lax.conv_general_dilated(
        xq, wq, window_strides=(stride, stride),
        padding=[(padding, padding), (padding, padding)],
        rhs_dilation=(dilation, dilation),
        dimension_numbers=("NCHW", "OIHW", "NCHW"))
    if conv_bias is not None:
        y = y + conv_bias.reshape(1, -1, 1, 1)
    if bn is not None:
        gamma, beta, mean, var = bn
        s = gamma / jnp.sqrt(var + eps)
        b = beta - mean * s
        y = y * s.reshape(1, -1, 1, 1) + b.reshape(1, -1, 1, 1)
    if relu:
        y = jnp.maximum(y, 0.0)
    return y


# ----------------------------------- main ---------------------------------------

if __name__ == "__main__":
    keys = jax.random.split(jax.random.PRNGKey(0), 12)

    B, cin, H, W = 2, 64, 16, 16
    x = jax.random.normal(keys[0], (B, cin, H, W), F32)

    # BasicConv(64, 128, kernel_size=3, padding=1, bn=True, relu=True, bias=False)
    cout3 = 128
    w3 = 0.05 * jax.random.normal(keys[1], (cout3, cin, 3, 3), F32)
    bn3 = (1.0 + 0.1 * jax.random.normal(keys[2], (cout3,), F32),
           0.1 * jax.random.normal(keys[3], (cout3,), F32),
           0.1 * jax.random.normal(keys[4], (cout3,), F32),
           jnp.abs(jax.random.normal(keys[5], (cout3,), F32)) + 0.5)
    out3 = basic_conv(x, w3, stride=1, padding=1, bn=bn3, relu=True)
    ref3 = _basic_conv_ref(x, w3, stride=1, padding=1, dilation=1,
                           bn=bn3, conv_bias=None, relu=True)

    # BasicConv(64, 32, kernel_size=1, bn=True, relu=True, bias=True)
    # (small-cout path: no lane padding, masked stores, conv-bias folding)
    cout1 = 32
    w1 = 0.05 * jax.random.normal(keys[6], (cout1, cin, 1, 1), F32)
    b1 = 0.05 * jax.random.normal(keys[7], (cout1,), F32)
    bn1 = (1.0 + 0.1 * jax.random.normal(keys[8], (cout1,), F32),
           0.1 * jax.random.normal(keys[9], (cout1,), F32),
           0.1 * jax.random.normal(keys[10], (cout1,), F32),
           jnp.abs(jax.random.normal(keys[11], (cout1,), F32)) + 0.5)
    out1 = basic_conv(x, w1, stride=1, padding=0, bn=bn1, conv_bias=b1, relu=True)
    ref1 = _basic_conv_ref(x, w1, stride=1, padding=0, dilation=1,
                           bn=bn1, conv_bias=b1, relu=True)

    # Native stride=2 path (no stride^2 wasted compute, no subsample pass).
    out3s = basic_conv(x, w3, stride=2, padding=1, bn=bn3, relu=True)
    ref3s = _basic_conv_ref(x, w3, stride=2, padding=1, dilation=1,
                            bn=bn3, conv_bias=None, relu=True)

    # Non-divisible row blocking: ho=16, th=6 -> cdiv grid with a partial block.
    out3p = basic_conv(x, w3, stride=1, padding=1, bn=bn3, relu=True,
                       block_rows=6)

    jax.block_until_ready((out3, out1, out3s, out3p))

    assert out3.shape == (B, cout3, H, W), out3.shape
    assert out1.shape == (B, cout1, H, W), out1.shape
    assert out3s.shape == (B, cout3, 8, 8), out3s.shape
    assert out3p.shape == (B, cout3, H, W), out3p.shape

    def _check(o, r, name):
        o = o.astype(F32)
        assert bool(jnp.allclose(o, r, atol=2e-2, rtol=2e-2)), \
            (name, float(jnp.max(jnp.abs(o - r))))

    _check(out3, ref3, "3x3 pad1")
    _check(out1, ref1, "1x1 bias")
    _check(out3s, ref3s, "3x3 stride2")
    _check(out3p, ref3, "3x3 partial row block")

    print("KERNEL_OK")
</pallas_src>

<mosaic_0001>
module attributes {stable_mosaic.version = 11 : i64} {
  func.func @_conv_bn_relu_kernel(%arg0: i32, %arg1: i32, %arg2: memref<1x18x1x1x18x64xbf16, #tpu.memory_space<vmem>>, %arg3: memref<576x128xbf16, #tpu.memory_space<vmem>>, %arg4: memref<1x128xf32, #tpu.memory_space<vmem>>, %arg5: memref<1x16x16x128xbf16, #tpu.memory_space<vmem>>) attributes {dimension_semantics = [#tpu.dimension_semantics<parallel>, #tpu.dimension_semantics<parallel>], iteration_bounds = array<i64: 2, 1>, scalar_prefetch = 0 : i64, scratch_operands = 0 : i64, tpu.core_type = #tpu.core_type<tc>, window_params = [{transform_indices = @transform_0, window_bounds = array<i64: 1, 18, 1, 1, 18, 64>}, {pipeline_mode = #tpu.pipeline_mode<synchronous>, transform_indices = @transform_1, window_bounds = array<i64: 576, 128>}, {pipeline_mode = #tpu.pipeline_mode<synchronous>, transform_indices = @transform_2, window_bounds = array<i64: 1, 128>}, {transform_indices = @transform_3, window_bounds = array<i64: 1, 16, 16, 128>}]} {
    %c16_i32 = arith.constant 16 : i32
    %0 = arith.muli %arg1, %c16_i32 : i32
    %1 = tpu.assume_multiple %0, 16 : i32
    %c0_i32 = arith.constant 0 : i32
    %2 = arith.addi %1, %c0_i32 : i32
    %c0 = arith.constant 0 : index
    %3 = arith.index_cast %2 : i32 to index
    %c0_0 = arith.constant 0 : index
    %c0_1 = arith.constant 0 : index
    %c0_2 = arith.constant 0 : index
    %c0_3 = arith.constant 0 : index
    %4 = vector.load %arg2[%c0, %3, %c0_0, %c0_1, %c0_2, %c0_3] : memref<1x18x1x1x18x64xbf16, #tpu.memory_space<vmem>>, vector<1x16x1x1x16x64xbf16>
    %5 = vector.shape_cast %4 : vector<1x16x1x1x16x64xbf16> to vector<16x16x64xbf16>
    %c0_i32_4 = arith.constant 0 : i32
    %6 = arith.addi %1, %c0_i32_4 : i32
    %c0_5 = arith.constant 0 : index
    %7 = arith.index_cast %6 : i32 to index
    %c0_6 = arith.constant 0 : index
    %c0_7 = arith.constant 0 : index
    %c1 = arith.constant 1 : index
    %c0_8 = arith.constant 0 : index
    %8 = vector.load %arg2[%c0_5, %7, %c0_6, %c0_7, %c1, %c0_8] : memref<1x18x1x1x18x64xbf16, #tpu.memory_space<vmem>>, vector<1x16x1x1x16x64xbf16>
    %9 = vector.shape_cast %8 : vector<1x16x1x1x16x64xbf16> to vector<16x16x64xbf16>
    %c0_i32_9 = arith.constant 0 : i32
    %10 = arith.addi %1, %c0_i32_9 : i32
    %c0_10 = arith.constant 0 : index
    %11 = arith.index_cast %10 : i32 to index
    %c0_11 = arith.constant 0 : index
    %c0_12 = arith.constant 0 : index
    %c2 = arith.constant 2 : index
    %c0_13 = arith.constant 0 : index
    %12 = vector.load %arg2[%c0_10, %11, %c0_11, %c0_12, %c2, %c0_13] : memref<1x18x1x1x18x64xbf16, #tpu.memory_space<vmem>>, vector<1x16x1x1x16x64xbf16>
    %13 = vector.shape_cast %12 : vector<1x16x1x1x16x64xbf16> to vector<16x16x64xbf16>
    %c1_i32 = arith.constant 1 : i32
    %14 = arith.addi %1, %c1_i32 : i32
    %c0_14 = arith.constant 0 : index
    %15 = arith.index_cast %14 : i32 to index
    %c0_15 = arith.constant 0 : index
    %c0_16 = arith.constant 0 : index
    %c0_17 = arith.constant 0 : index
    %c0_18 = arith.constant 0 : index
    %16 = vector.load %arg2[%c0_14, %15, %c0_15, %c0_16, %c0_17, %c0_18] : memref<1x18x1x1x18x64xbf16, #tpu.memory_space<vmem>>, vector<1x16x1x1x16x64xbf16>
    %17 = vector.shape_cast %16 : vector<1x16x1x1x16x64xbf16> to vector<16x16x64xbf16>
    %c1_i32_19 = arith.constant 1 : i32
    %18 = arith.addi %1, %c1_i32_19 : i32
    %c0_20 = arith.constant 0 : index
    %19 = arith.index_cast %18 : i32 to index
    %c0_21 = arith.constant 0 : index
    %c0_22 = arith.constant 0 : index
    %c1_23 = arith.constant 1 : index
    %c0_24 = arith.constant 0 : index
    %20 = vector.load %arg2[%c0_20, %19, %c0_21, %c0_22, %c1_23, %c0_24] : memref<1x18x1x1x18x64xbf16, #tpu.memory_space<vmem>>, vector<1x16x1x1x16x64xbf16>
    %21 = vector.shape_cast %20 : vector<1x16x1x1x16x64xbf16> to vector<16x16x64xbf16>
    %c1_i32_25 = arith.constant 1 : i32
    %22 = arith.addi %1, %c1_i32_25 : i32
    %c0_26 = arith.constant 0 : index
    %23 = arith.index_cast %22 : i32 to index
    %c0_27 = arith.constant 0 : index
    %c0_28 = arith.constant 0 : index
    %c2_29 = arith.constant 2 : index
    %c0_30 = arith.constant 0 : index
    %24 = vector.load %arg2[%c0_26, %23, %c0_27, %c0_28, %c2_29, %c0_30] : memref<1x18x1x1x18x64xbf16, #tpu.memory_space<vmem>>, vector<1x16x1x1x16x64xbf16>
    %25 = vector.shape_cast %24 : vector<1x16x1x1x16x64xbf16> to vector<16x16x64xbf16>
    %c2_i32 = arith.constant 2 : i32
    %26 = arith.addi %1, %c2_i32 : i32
    %c0_31 = arith.constant 0 : index
    %27 = arith.index_cast %26 : i32 to index
    %c0_32 = arith.constant 0 : index
    %c0_33 = arith.constant 0 : index
    %c0_34 = arith.constant 0 : index
    %c0_35 = arith.constant 0 : index
    %28 = vector.load %arg2[%c0_31, %27, %c0_32, %c0_33, %c0_34, %c0_35] : memref<1x18x1x1x18x64xbf16, #tpu.memory_space<vmem>>, vector<1x16x1x1x16x64xbf16>
    %29 = vector.shape_cast %28 : vector<1x16x1x1x16x64xbf16> to vector<16x16x64xbf16>
    %c2_i32_36 = arith.constant 2 : i32
    %30 = arith.addi %1, %c2_i32_36 : i32
    %c0_37 = arith.constant 0 : index
    %31 = arith.index_cast %30 : i32 to index
    %c0_38 = arith.constant 0 : index
    %c0_39 = arith.constant 0 : index
    %c1_40 = arith.constant 1 : index
    %c0_41 = arith.constant 0 : index
    %32 = vector.load %arg2[%c0_37, %31, %c0_38, %c0_39, %c1_40, %c0_41] : memref<1x18x1x1x18x64xbf16, #tpu.memory_space<vmem>>, vector<1x16x1x1x16x64xbf16>
    %33 = vector.shape_cast %32 : vector<1x16x1x1x16x64xbf16> to vector<16x16x64xbf16>
    %c2_i32_42 = arith.constant 2 : i32
    %34 = arith.addi %1, %c2_i32_42 : i32
    %c0_43 = arith.constant 0 : index
    %35 = arith.index_cast %34 : i32 to index
    %c0_44 = arith.constant 0 : index
    %c0_45 = arith.constant 0 : index
    %c2_46 = arith.constant 2 : index
    %c0_47 = arith.constant 0 : index
    %36 = vector.load %arg2[%c0_43, %35, %c0_44, %c0_45, %c2_46, %c0_47] : memref<1x18x1x1x18x64xbf16, #tpu.memory_space<vmem>>, vector<1x16x1x1x16x64xbf16>
    %37 = vector.shape_cast %36 : vector<1x16x1x1x16x64xbf16> to vector<16x16x64xbf16>
    %38 = tpu.concatenate %5, %9, %13, %17, %21, %25, %29, %33, %37 in 2 : vector<16x16x64xbf16>, vector<16x16x64xbf16>, vector<16x16x64xbf16>, vector<16x16x64xbf16>, vector<16x16x64xbf16>, vector<16x16x64xbf16>, vector<16x16x64xbf16>, vector<16x16x64xbf16>, vector<16x16x64xbf16> -> vector<16x16x576xbf16>
    %39 = vector.shape_cast %38 : vector<16x16x576xbf16> to vector<256x576xbf16>
    %c0_48 = arith.constant 0 : index
    %c0_49 = arith.constant 0 : index
    %40 = vector.load %arg3[%c0_48, %c0_49] : memref<576x128xbf16, #tpu.memory_space<vmem>>, vector<576x128xbf16>
    %cst = arith.constant dense<0.000000e+00> : vector<256x128xf32>
    %41 = tpu.matmul %39, %40, %cst {dimension_numbers = #tpu.dot_dimension_numbers<[1], [0], [0], [1], [0, 0, 1, 1], [], []>} : vector<256x576xbf16>, vector<576x128xbf16>, vector<256x128xf32> -> vector<256x128xf32>
    %c0_50 = arith.constant 0 : index
    %c0_51 = arith.constant 0 : index
    %42 = vector.load %arg4[%c0_50, %c0_51] : memref<1x128xf32, #tpu.memory_space<vmem>>, vector<1x128xf32>
    %43 = vector.broadcast %42 : vector<1x128xf32> to vector<256x128xf32>
    %44 = arith.addf %41, %43 : vector<256x128xf32>
    %cst_52 = arith.constant 0.000000e+00 : f32
    %45 = vector.broadcast %cst_52 : f32 to vector<256x128xf32>
    %46 = arith.maximumf %44, %45 : vector<256x128xf32>
    %47 = vector.shape_cast %46 : vector<256x128xf32> to vector<1x16x16x128xf32>
    %48 = arith.truncf %47 : vector<1x16x16x128xf32> to vector<1x16x16x128xbf16>
    %c0_53 = arith.constant 0 : index
    %c0_54 = arith.constant 0 : index
    %c0_55 = arith.constant 0 : index
    %c0_56 = arith.constant 0 : index
    %49 = vector.load %arg5[%c0_53, %c0_54, %c0_55, %c0_56] : memref<1x16x16x128xbf16, #tpu.memory_space<vmem>>, vector<1x16x16x128xbf16>
    tpu.vector_store %arg5[%c0_53, %c0_54, %c0_55, %c0_56], %48 {strides = array<i32>} : memref<1x16x16x128xbf16, #tpu.memory_space<vmem>>, vector<1x16x16x128xbf16>,
    return
  }
  func.func @transform_0(%arg0: i32, %arg1: i32) -> (i32, i32, i32, i32, i32, i32) {
    %c0_i32 = arith.constant 0 : i32
    %c0_i32_0 = arith.constant 0 : i32
    %c0_i32_1 = arith.constant 0 : i32
    %c0_i32_2 = arith.constant 0 : i32
    %c0_i32_3 = arith.constant 0 : i32
    %c0_i32_4 = arith.constant 0 : i32
    return %arg0, %c0_i32, %c0_i32_0, %c0_i32_1, %c0_i32_2, %c0_i32_3 : i32, i32, i32, i32, i32, i32
  }
  func.func @transform_1(%arg0: i32, %arg1: i32) -> (i32, i32) {
    %c0_i32 = arith.constant 0 : i32
    %c0_i32_0 = arith.constant 0 : i32
    %c0_i32_1 = arith.constant 0 : i32
    return %c0_i32, %c0_i32_0 : i32, i32
  }
  func.func @transform_2(%arg0: i32, %arg1: i32) -> (i32, i32) {
    %c0_i32 = arith.constant 0 : i32
    %c0_i32_0 = arith.constant 0 : i32
    %c0_i32_1 = arith.constant 0 : i32
    return %c0_i32, %c0_i32_0 : i32, i32
  }
  func.func @transform_3(%arg0: i32, %arg1: i32) -> (i32, i32, i32, i32) {
    %c0_i32 = arith.constant 0 : i32
    %c0_i32_0 = arith.constant 0 : i32
    %c0_i32_1 = arith.constant 0 : i32
    return %arg0, %arg1, %c0_i32, %c0_i32_0 : i32, i32, i32, i32
  }
}

</mosaic_0001>

<bundles_post_ra>
// kernel: tpu_custom_call.1
= control target key start
LH: loop header
LB: loop body
LE: loop exit
PB: predicated region body
PF: predicated region fallthrough
CT: control target
= control target key end

     0   :  { %8 = vsyncpa [#allocation3], 0  ;;  %s5660_s0 = inlined_call_operand.vmem [shape: bf16[2,18,1,1,18,64], index: 0, kind: input, shape index: {}]   ;;  %s5661_s1 = inlined_call_operand.vmem [shape: bf16[576,128], index: 1, kind: input, shape index: {}]   ;;  %s5662_s2 = inlined_call_operand.vmem [shape: f32[1,128], index: 2, kind: input, shape index: {}]   ;;  %s5663_s3 = inlined_call_operand.hbm [shape: bf16[2,16,16,128], index: 3, kind: output, shape index: {}]  }
   0x1   :  { %10 = vsyncpa [#allocation3 + $0x1], 0  ;;  %s4314_s12 = smov 0   ;;  %s4316_s13 = smov 0  }
   0x2   :  { %s4318_s14 = smov 0   ;;  %s4320_s15 = smov 0  }
   0x3   :  { %s4322_s16 = smov 0   ;;  %s4324_s17 = smov 0  }
   0x4 LB: > { %s3110_s18 = sadd.s32 4294967295, %s4289_s17   ;;  %s3111_s19 = sadd.s32 4294967294, %s4289_s17   ;;  %s4289_s17 = sphi %s4324_s17, %s16_s17   ;;  %s4285_s16 = sphi %s4322_s16, %s5738_s16   ;;  %s4281_s15 = sphi %s4320_s15, %s5737_s15   ;;  %s4277_s14 = sphi %s4318_s14, %s5736_s14   ;;  %s4273_s13 = sphi %s4316_s13, %s5735_s13   ;;  %s4269_s12 = sphi %s4314_s12, %s5734_s12  }
   0x5   : > { %s28_s20 = sadd.s32 1, %s4285_s16  ;;  %s105_s21 = sadd.s32 1, %s4277_s14 }
   0x6   : > { %p30_p0 = scmp.ge.s32.totalorder %s28_s20, 2  ;;  %p115_p1 = scmp.ne.s32.totalorder %s4277_s14, %s4273_s13 }
   0x7   : > { %p116_p2 = scmp.eq.s32.totalorder %s3110_s18, 1  ;;  %p121_p3 = scmp.ne.s32.totalorder %s4273_s13, %s4269_s12 }
   0x8   : > { %s5740_s20 = smov (%p30_p0, %s28_s20), 0  ;;  %p122_p5 = scmp.eq.s32.totalorder %s3111_s19, 1 }
   0x9   : > { %p4354_p4 = por %p116_p2, %p115_p1  ;;  %s100_s23 = ssub.s32 %s4285_s16, %s5740_s20 }
   0xa   : > { %p3114_p6 = scmp.ge.s32.totalorder %s4289_s17, 1  ;;  %p103_p7 = scmp.eq.s32.totalorder %s100_s23, 0 }
   0xb   : > { %p4361_p8 = por %p122_p5, %p121_p3  ;;  %p154_p9 = scmp.lt.s32.totalorder %s4289_s17, 3 }
   0xc   : > { %s4367_s25 = scalar_select %p103_p7, %s4277_s14, %s105_s21  }
   0xd   : > { %p155_p10 = pnand %p3114_p6, %p154_p9 }
   0xf   : > { %158 = sbr.rel (%p155_p10) target bundleno = 549 (0x225), region = 32 }
  0x16   : > { %p178_p11 = scmp.lt.s32.totalorder %s4281_s15, 1  ;;  %v4046_v0 = vld [vmem:[%s5661_s1 + $0x40] sm:$0xff]   ;;  %v4051_v2 = vld [vmem:[%s5661_s1 + $0x48] sm:$0xff]   ;;  %v4057_v4 = vld [vmem:[%s5661_s1 + $0x50] sm:$0xff]   ;;  %s4291_s26 = smov 64   ;;  %vm790_vm1 = vcmask 1046528  }
  0x17   : > { %3891 = vmatprep.subr.bf16.mxu1 %v4046_v0  ;;  %v4047_v1 = vld [vmem:[%s5661_s1] sm:$0xff]   ;;  %3607 = vmatprep.subr.bf16.mxu0 %v4046_v0  ;;  %v4052_v3 = vld [vmem:[%s5661_s1 + $0x8] sm:$0xff]   ;;  %v4058_v10 = vld [vmem:[%s5661_s1 + $0x10] sm:$0xff]   ;;  %vm517_vm0 = vsmask.f32 7424  ;;  %vm1767_vm2 = vcmask 523264  }
  0x18   : > { %s179_s28 = scalar_select %p178_p11, %s4281_s15, 1  ;;  %3899 = vmatpush3.bf16.msra.mxu1 %v4047_v1  ;;  %3608 = vmatpush3.bf16.msra.mxu0 %v4047_v1  ;;  %v4059_v16 = vld [vmem:[%s5661_s1 + $0x58] sm:$0xff]   ;;  %v4064_v46 = vld [vmem:[%s5661_s1 + $0x60] sm:$0xff]  }
  0x19   : > { %3892 = vmatprep.subr.bf16.mxu1 %v4051_v2  ;;  %3609 = vmatprep.subr.bf16.mxu0 %v4051_v2  ;;  %v4062_v31 = vld [vmem:[%s5661_s1 + $0x18] sm:$0xff]   ;;  %s3511_s4 = sshll.u32 %s4281_s15, 11  ;;  %s4292_s10 = smov [#allocation2]  }
  0x1a   : > { %s3907_s6 = smul.u32 216, %s179_s28  ;;  %s175_s28 = sand.u32 1, %s4273_s13  }
  0x1b   : > { %s3115_s29 = sshll.u32 %s175_s28, 7  ;;  %s5604_s8 = scalar_lea.hbm %s5663_s3, %s3511_s4 }
  0x1c   : > { %s4389_s19 = scalar_lea.vmem %s5660_s0, %s3907_s6  ;;  %3900 = vmatpush3.bf16.msra.mxu1 %v4052_v3  ;;  %3610 = vmatpush3.bf16.msra.mxu0 %v4052_v3  ;;  %s5535_s30 = scalar_lea.vmem [#allocation2], %s3115_s29 }
  0x1d   : > { %v3141_v5 = vld [vmem:[%s4389_s19 + $0x9c] sm:$0xf]  ;;  %v3142_v6 = vld [vmem:[%s4389_s19 + $0xa0] sm:$0xf]  ;;  %v3117_v8 = vld [vmem:[%s4389_s19 + $0xc] sm:$0xf]  ;;  %3893 = vmatprep.subr.bf16.mxu1 %v4057_v4  ;;  %3611 = vmatprep.subr.bf16.mxu0 %v4057_v4 }
  0x1e   : > { %v4393_v7 = vcombine.low %v3141_v5, %v3142_v6  ;;  %v4397_v9 = vld [vmem:[%s4389_s19 + $0x10] sm:$0xf]  ;;  %v214_v13 = vld [vmem:[%s4389_s19 + $0x94] sm:$0xf]  ;;  %v189_v17 = vld [vmem:[%s4389_s19] sm:$0xf] }
  0x1f   : > { %v4403_v11 = vcombine.low %v3117_v8, %v4397_v9  ;;  %v213_v12 = vld [vmem:[%s4389_s19 + $0x90] sm:$0xf]  ;;  %v3970_v15 = vld [vmem:[%s4389_s19 + $0x98] ss:$0 sps:$4 sm:$0x11]   ;;  %s3027_s5 = sshll.u32 %s5535_s30, 4  ;;  %s5606_s5 = int_to_ptr.vmem [resolvable:$true] %s3027_s5 }
  0x20   : > { %943 = vrot.lane.b32.xlu0 %v4393_v7, %s4291_s26  ;;  %v4409_v14 = vcombine.low %v213_v12, %v214_v13  ;;  %v190_v18 = vld [vmem:[%s4389_s19 + $0x4] sm:$0xf]  ;;  %v670_v21 = vshll.u32 %v3970_v15, 16  ;;  %3901 = vmatpush3.bf16.msra.mxu1 %v4058_v10  ;;  %v3972_v23 = vld [vmem:[%s4389_s19 + $0x8] ss:$0 sps:$4 sm:$0x11]  }
  0x21   : > { %919 = vrot.lane.b32.xlu1 %v4403_v11, %s4291_s26  ;;  %3612 = vmatpush3.bf16.msra.mxu0 %v4058_v10  ;;  %v4421_v22 = vcombine.low %v189_v17, %v190_v18  ;;  %v3143_v26 = vld [vmem:[%s4389_s19 + $0xa8] sm:$0xf]  ;;  %v526_v29 = vshll.u32 %v3972_v23, 16  ;;  %v215_v30 = vld [vmem:[%s4389_s19 + $0x9c] sm:$0xf]  ;;  %v4065_v17 = vld [vmem:[%s5661_s1 + $0x20] sm:$0xff]  }
  0x22   : > { %v663_v19 = vshrl.u32 %v4409_v14, 16  ;;  %v665_v20 = vshll.u32 %v4409_v14, 16  ;;  %3894 = vmatprep.subr.bf16.mxu1 %v4059_v16  ;;  %3613 = vmatprep.subr.bf16.mxu0 %v4059_v16  ;;  %v672_v25 = vrot.slane %v670_v21, 1  ;;  %v3144_v33 = vld [vmem:[%s4389_s19 + $0xac] sm:$0xf]  ;;  %s5612_s15 = scalar_lea.sflag [#allocation3], %s175_s28 }
  0x23   : > { %v519_v27 = vshrl.u32 %v4421_v22, 16  ;;  %v521_v28 = vshll.u32 %v4421_v22, 16  ;;  %v216_v34 = vld [vmem:[%s4389_s19 + $0xa0] sm:$0xf]  ;;  %v528_v36 = vrot.slane %v526_v29, 1  ;;  %v4442_v43 = vcombine.low %v3143_v26, %v3144_v33  ;;  %v4069_v26 = vld [vmem:[%s5661_s1 + $0x28] sm:$0xff]  }
  0x24   : > { %v667_v24 = vrot.slane %v665_v20, 1  ;;  %3902 = vmatpush3.bf16.msra.mxu1 %v4062_v31  ;;  %v4434_v38 = vcombine.low %v215_v30, %v216_v34  ;;  %v3976_v39 = vld [vmem:[%s4389_s19 + $0xa4] ss:$0 sps:$4 sm:$0x11]   ;;  %v3119_v40 = vld [vmem:[%s4389_s19 + $0x18] sm:$0xf] }
  0x25   : > { %v523_v35 = vrot.slane %v521_v28, 1  ;;  %3614 = vmatpush3.bf16.msra.mxu0 %v4062_v31  ;;  %v4439_v41 = vld [vmem:[%s4389_s19 + $0x1c] sm:$0xf]  ;;  %v191_v44 = vld [vmem:[%s4389_s19 + $0xc] sm:$0xf]  ;;  %v682_v49 = vshll.u32 %v3976_v39, 16  ;;  %3895 = vmatprep.subr.bf16.mxu1 %v4064_v46 }
  0x26   : > { %v668_v32 = vor.u32 %v667_v24, %v663_v19  ;;  %v192_v45 = vld [vmem:[%s4389_s19 + $0x10] sm:$0xf]  ;;  %v675_v47 = vshrl.u32 %v4434_v38, 16  ;;  %v677_v48 = vshll.u32 %v4434_v38, 16  ;;  %3615 = vmatprep.subr.bf16.mxu0 %v4064_v46  ;;  %v3145_v55 = vld [vmem:[%s4389_s19 + $0xb4] sm:$0xf]  ;;  %v4461_v57 = vcombine.low %v3119_v40, %v4439_v41 }
  0x27   : > { %v524_v42 = vor.u32 %v523_v35, %v519_v27  ;;  %v4452_v51 = vcombine.low %v191_v44, %v192_v45  ;;  %v3980_v52 = vld [vmem:[%s4389_s19 + $0x14] ss:$0 sps:$4 sm:$0x11]   ;;  %v684_v54 = vrot.slane %v682_v49, 1  ;;  %v3146_v56 = vld [vmem:[%s4389_s19 + $0xb8] sm:$0xf] }
  0x28   : > { %v673_v37 = vsel %vm517_vm0, %v668_v32, %v672_v25  ;;  %v679_v53 = vrot.slane %v677_v48, 1  ;;  %v538_v60 = vshll.u32 %v3980_v52, 16  ;;  %v217_v61 = vld [vmem:[%s4389_s19 + $0xa8] sm:$0xf]  ;;  %v218_v63 = vld [vmem:[%s4389_s19 + $0xac] sm:$0xf]  ;;  %v4471_v5 = vcombine.low %v3145_v55, %v3146_v56  ;;  %3903 = vmatpush3.bf16.msra.mxu1 %v4065_v17 }
  0x29   : > { %734 = vrot.lane.b32.xlu0 %v673_v37, %s4291_s26  ;;  %v529_v50 = vsel %vm517_vm0, %v524_v42, %v528_v36  ;;  %v531_v58 = vshrl.u32 %v4452_v51, 16  ;;  %v533_v59 = vshll.u32 %v4452_v51, 16  ;;  %v4467_v2 = vcombine.low %v217_v61, %v218_v63  ;;  %v3984_v3 = vld [vmem:[%s4389_s19 + $0xb0] ss:$0 sps:$4 sm:$0x11]   ;;  %v4066_v19 = vld [vmem:[%s5661_s1 + $0x68] sm:$0xff]   ;;  %3616 = vmatpush3.bf16.msra.mxu0 %v4065_v17 }
  0x2a   : > { %710 = vrot.lane.b32.xlu1 %v529_v50, %s4291_s26  ;;  %v680_v62 = vor.u32 %v679_v53, %v675_v47  ;;  %v540_v1 = vrot.slane %v538_v60, 1  ;;  %v3121_v6 = vld [vmem:[%s4389_s19 + $0x24] sm:$0xf]  ;;  %v4475_v8 = vld [vmem:[%s4389_s19 + $0x28] sm:$0xf]  ;;  %v694_v15 = vshll.u32 %v3984_v3, 16  ;;  %3896 = vmatprep.subr.bf16.mxu1 %v4066_v19 }
  0x2b   : > { %v535_v0 = vrot.slane %v533_v59, 1  ;;  %v687_v12 = vshrl.u32 %v4467_v2, 16  ;;  %v689_v13 = vshll.u32 %v4467_v2, 16  ;;  %v193_v16 = vld [vmem:[%s4389_s19 + $0x18] sm:$0xf]  ;;  %v4498_v27 = vcombine.low %v3121_v6, %v4475_v8  ;;  %3617 = vmatprep.subr.bf16.mxu0 %v4066_v19  ;;  %v4071_v33 = vld [vmem:[%s5661_s1 + $0x70] sm:$0xff]  }
  0x2c   : > { %v685_v4 = vsel %vm517_vm0, %v680_v62, %v684_v54  ;;  %v194_v18 = vld [vmem:[%s4389_s19 + $0x1c] sm:$0xf]  ;;  %v696_v23 = vrot.slane %v694_v15, 1  ;;  %v3988_v25 = vld [vmem:[%s4389_s19 + $0x20] ss:$0 sps:$4 sm:$0x11]   ;;  %3904 = vmatpush3.bf16.msra.mxu1 %v4069_v26 }
  0x2d   : > { %945 = vrot.lane.b32.xlu0 %v4442_v43, %s4291_s26  ;;  %v536_v10 = vor.u32 %v535_v0, %v531_v58  ;;  %v691_v21 = vrot.slane %v689_v13, 1  ;;  %v4491_v24 = vcombine.low %v193_v16, %v194_v18  ;;  %v550_v31 = vshll.u32 %v3988_v25, 16  ;;  %v3147_v32 = vld [vmem:[%s4389_s19 + $0xc0] sm:$0xf]  ;;  %v3148_v34 = vld [vmem:[%s4389_s19 + $0xc4] sm:$0xf]  ;;  %3618 = vmatpush3.bf16.msra.mxu0 %v4069_v26 }
  0x2e   : > { %736 = vrot.lane.b32.xlu1 %v685_v4, %s4291_s26  ;;  %v219_v35 = vld [vmem:[%s4389_s19 + $0xb4] sm:$0xf]  ;;  %v220_v36 = vld [vmem:[%s4389_s19 + $0xb8] sm:$0xf]  ;;  %v3165_v44 = vld [vmem:[%s4389_s19 + $0xc] sm:$0xe]  ;;  %3897 = vmatprep.subr.bf16.mxu1 %v4071_v33  ;;  %v4523_v48 = vcombine.low %v3147_v32, %v3148_v34 }
  0x2f   : > { %v541_v20 = vsel %vm517_vm0, %v536_v10, %v540_v1  ;;  %v692_v28 = vor.u32 %v691_v21, %v687_v12  ;;  %v543_v29 = vshrl.u32 %v4491_v24, 16  ;;  %v545_v30 = vshll.u32 %v4491_v24, 16  ;;  %v3992_v45 = vld [vmem:[%s4389_s19 + $0xbc] ss:$0 sps:$4 sm:$0x11]   ;;  %v4072_v46 = vld [vmem:[%s5661_s1 + $0x30] sm:$0xff]   ;;  %3619 = vmatprep.subr.bf16.mxu0 %v4071_v33 }
  0x30   : > { %v552_v40 = vrot.slane %v550_v31, 1  ;;  %v4513_v42 = vcombine.low %v219_v35, %v220_v36  ;;  %v3123_v52 = vld [vmem:[%s4389_s19 + $0x30] sm:$0xf]  ;;  %v4529_v53 = vld [vmem:[%s4389_s19 + $0x34] sm:$0xf]  ;;  %v706_v54 = vshll.u32 %v3992_v45, 16  ;;  %3905 = vmatpush3.bf16.msra.mxu1 %v4072_v46  ;;  %v3325_v62 = vcombine.low %v3165_v44, %v4397_v9 }
  0x31   : > { %921 = vrot.lane.b32.xlu0 %v4461_v57, %s4291_s26  ;;  %v697_v37 = vsel %vm517_vm0, %v692_v28, %v696_v23  ;;  %v547_v39 = vrot.slane %v545_v30, 1  ;;  %v195_v55 = vld [vmem:[%s4389_s19 + $0x24] sm:$0xf]  ;;  %v196_v56 = vld [vmem:[%s4389_s19 + $0x28] sm:$0xf]  ;;  %3620 = vmatpush3.bf16.msra.mxu0 %v4072_v46  ;;  %v4539_v0 = vcombine.low %v3123_v52, %v4529_v53  ;;  %v4073_v9 = vld [vmem:[%s5661_s1 + $0x78] sm:$0xff]  }
  0x32   : > { %712 = vrot.lane.b32.xlu1 %v541_v20, %s4291_s26  ;;  %v699_v49 = vshrl.u32 %v4513_v42, 16  ;;  %v701_v50 = vshll.u32 %v4513_v42, 16  ;;  %v4534_v60 = vcombine.low %v195_v55, %v196_v56  ;;  %v3996_v61 = vld [vmem:[%s4389_s19 + $0x2c] ss:$0 sps:$4 sm:$0x11]   ;;  %v708_v63 = vrot.slane %v706_v54, 1  ;;  %3898 = vmatprep.subr.bf16.mxu1 %v4073_v9 }
  0x33   : > { %v548_v47 = vor.u32 %v547_v39, %v543_v29  ;;  %v3181_v1 = vld [vmem:[%s4389_s19 + $0x18] sm:$0xf]  ;;  %v562_v10 = vshll.u32 %v3996_v61, 16  ;;  %v3182_v12 = vld [vmem:[%s4389_s19 + $0x1c] sm:$0xf]  ;;  %3621 = vmatprep.subr.bf16.mxu0 %v4073_v9  ;;  %v1239_v28 = vrot.slane %v3325_v62, 1 }
  0x34   : > { %v703_v59 = vrot.slane %v701_v50, 1  ;;  %v555_v4 = vshrl.u32 %v4534_v60, 16  ;;  %v557_v6 = vshll.u32 %v4534_v60, 16  ;;  %v4551_v13 = vcombine.low %v3181_v1, %v3182_v12  ;;  %v3998_v15 = vld [vmem:[%s4389_s19 + $0x20] ss:$0 sps:$4 sm:$0x11]  }
  0x35   : > { %947 = vrot.lane.b32.xlu0 %v4471_v5, %s4291_s26  ;;  %v553_v58 = vsel %vm517_vm0, %v548_v47, %v552_v40  ;;  %v564_v18 = vrot.slane %v562_v10, 1  ;;  %v1455_v21 = vshll.u32 %v3998_v15, 16  ;;  %v3999_v23 = vld [vmem:[%s4389_s19 + $0x14] ss:$0 sps:$4 sm:$0x11]   ;;  %v4076_v34 = vld [vmem:[%s5661_s1 + $0x38] sm:$0xff]  }
  0x36   : > { %738 = vrot.lane.b32.xlu1 %v697_v37, %s4291_s26  ;;  %v704_v3 = vor.u32 %v703_v59, %v699_v49  ;;  %v559_v17 = vrot.slane %v557_v6, 1  ;;  %v1448_v19 = vshrl.u32 %v4551_v13, 16  ;;  %v1450_v20 = vshll.u32 %v4551_v13, 16  ;;  %v3166_v25 = vld [vmem:[%s4389_s19 + $0x18] sm:$0xe]  ;;  %3906 = vmatpush3.bf16.msra.mxu1 %v4076_v34  ;;  %v4079_v45 = vld [vmem:[%s5661_s1 + $0xc0] sm:$0xff]  }
  0x37   : > { %v1457_v30 = vrot.slane %v1455_v21, 1  ;;  %v1240_v31 = vrot.slane %v3999_v23, 1  ;;  %v3125_v32 = vld [vmem:[%s4389_s19 + $0x3c] sm:$0xf]  ;;  %v197_v33 = vld [vmem:[%s4389_s19 + $0x30] sm:$0xf]  ;;  %3622 = vmatpush3.bf16.msra.mxu0 %v4076_v34  ;;  %v3326_v46 = vcombine.low %v3166_v25, %v4439_v41  ;;  %3719 = vmatprep.subr.bf16.mxu1 %v4079_v45 }
  0x38   : > { %v709_v16 = vsel %vm517_vm0, %v704_v3, %v708_v63  ;;  %v560_v26 = vor.u32 %v559_v17, %v555_v4  ;;  %v1452_v29 = vrot.slane %v1450_v20, 1  ;;  %v198_v36 = vld [vmem:[%s4389_s19 + $0x34] sm:$0xf]  ;;  %v3183_v37 = vld [vmem:[%s4389_s19 + $0x24] sm:$0xf]  ;;  %s4211_s9 = scalar_lea.vmem %s5606_s5, 2048 }
  0x39   : > { %923 = vrot.lane.b32.xlu0 %v4498_v27, %s4291_s26  ;;  %v4571_v40 = vld [vmem:[%s4389_s19 + $0x40] sm:$0xf]  ;;  %v4003_v44 = vld [vmem:[%s4389_s19 + $0x38] ss:$0 sps:$4 sm:$0x11]   ;;  %v4579_v47 = vcombine.low %v197_v33, %v198_v36  ;;  %v1241_v52 = vsel %vm790_vm1, %v1239_v28, %v1240_v31  ;;  %v1242_v15 = vrot.slane %v3326_v46, 1  ;;  %p4212_p12 = scmp.ne.s32.totalorder %s5606_s5, %s4211_s9 }
  0x3a   : > { %714 = vrot.lane.b32.xlu1 %v553_v58, %s4291_s26  ;;  %v565_v35 = vsel %vm517_vm0, %v560_v26, %v564_v18  ;;  %v1453_v39 = vor.u32 %v1452_v29, %v1448_v19  ;;  %v3184_v49 = vld [vmem:[%s4389_s19 + $0x28] sm:$0xf]  ;;  %v574_v54 = vshll.u32 %v4003_v44, 16  ;;  %v4005_v56 = vld [vmem:[%s4389_s19 + $0x2c] ss:$0 sps:$4 sm:$0x11]   ;;  %v4589_v58 = vcombine.low %v3125_v32, %v4571_v40 }
  0x3b   : > { %v4584_v55 = vcombine.low %v3183_v37, %v3184_v49  ;;  %v567_v41 = vshrl.u32 %v4579_v47, 16  ;;  %v569_v59 = vshll.u32 %v4579_v47, 16  ;;  %v4006_v61 = vld [vmem:[%s4389_s19 + $0x20] ss:$0 sps:$4 sm:$0x11]   ;;  %v1467_v1 = vshll.u32 %v4005_v56, 16  ;;  %p4213_p13 = pnand %p4212_p12, %p4354_p4 }
  0x3c   : > { %v1458_v50 = vsel %vm517_vm0, %v1453_v39, %v1457_v30  ;;  %v3167_v3 = vld [vmem:[%s4389_s19 + $0x24] sm:$0xe]  ;;  %v576_v6 = vrot.slane %v574_v54, 1  ;;  %v3127_v17 = vld [vmem:[%s4389_s19 + $0x48] sm:$0xf]  ;;  %s4215_s11 = sshll.u32 %s4292_s10, 4  ;;  %s4216_s11 = int_to_ptr.vmem [resolvable:$false] %s4215_s11 }
  0x3d   : > { %949 = vrot.lane.b32.xlu0 %v4523_v48, %s4291_s26  ;;  %v1460_v62 = vshrl.u32 %v4584_v55, 16  ;;  %v1462_v63 = vshll.u32 %v4584_v55, 16  ;;  %v571_v4 = vrot.slane %v569_v59, 1  ;;  %v4601_v10 = vld [vmem:[%s5661_s1 + $0x100] sm:$0xff]   ;;  %v1469_v9 = vrot.slane %v1467_v1, 1  ;;  %p4214_p0 = pneg %p4213_p13  ;;  %s4217_s18 = scalar_lea.vmem %s4216_s11, 4096 }
  0x3e   : > { %740 = vrot.lane.b32.xlu1 %v709_v16, %s4291_s26  ;;  %v1243_v16 = vrot.slane %v4006_v61, 1  ;;  %v199_v18 = vld [vmem:[%s4389_s19 + $0x3c] sm:$0xf]  ;;  %v4608_v20 = vld [vmem:[%s4389_s19 + $0x4c] sm:$0xf]  ;;  %3851 = vmatprep.subr.bf16.mxu0 %v4601_v10  ;;  %v3327_v29 = vcombine.low %v3167_v3, %v4475_v8  ;;  %p4218_p1 = scmp.lt.s32.totalorder %s5606_s5, %s4216_s11  ;;  %p4219_p2 = scmp.lt.s32.totalorder %s4217_s18, %s4211_s9 }
  0x3f   : > { %v1464_v12 = vrot.slane %v1462_v63, 1  ;;  %v572_v19 = vor.u32 %v571_v4, %v567_v41  ;;  %v200_v21 = vld [vmem:[%s4389_s19 + $0x40] sm:$0xf]  ;;  %v4010_v26 = vld [vmem:[%s4389_s19 + $0x44] ss:$0 sps:$4 sm:$0x11]   ;;  %v4627_v37 = vcombine.low %v3127_v17, %v4608_v20 }
  0x40   : > { %v4612_v25 = vcombine.low %v199_v18, %v200_v21  ;;  %v3185_v28 = vld [vmem:[%s4389_s19 + $0x30] sm:$0xf]  ;;  %v3186_v31 = vld [vmem:[%s4389_s19 + $0x34] sm:$0xf]  ;;  %v1244_v36 = vsel %vm790_vm1, %v1242_v15, %v1243_v16  ;;  %v586_v8 = vshll.u32 %v4010_v26, 16  ;;  %v1245_v56 = vrot.slane %v3327_v29, 1  ;;  %p4220_p3 = por %p4219_p2, %p4218_p1 }
  0x41   : > { %925 = vrot.lane.b32.xlu0 %v4539_v0, %s4291_s26  ;;  %v1465_v23 = vor.u32 %v1464_v12, %v1460_v62  ;;  %v577_v30 = vsel %vm517_vm0, %v572_v19, %v576_v6  ;;  %v4629_v39 = vcombine.low %v3185_v28, %v3186_v31  ;;  %v4013_v44 = vld [vmem:[%s4389_s19 + $0x2c] ss:$0 sps:$4 sm:$0x11]   ;;  %v3168_v45 = vld [vmem:[%s4389_s19 + $0x30] sm:$0xe] }
  0x42   : > { %716 = vrot.lane.b32.xlu1 %v565_v35, %s4291_s26  ;;  %v579_v33 = vshrl.u32 %v4612_v25, 16  ;;  %v581_v34 = vshll.u32 %v4612_v25, 16  ;;  %v4012_v35 = vld [vmem:[%s4389_s19 + $0x38] ss:$0 sps:$4 sm:$0x11]   ;;  %v1246_v62 = vrot.slane %v4013_v44, 1  ;;  %p4221_p5 = pnand %p4220_p3, %p4214_p0 }
  0x43   : > { %v1470_v32 = vsel %vm517_vm0, %v1465_v23, %v1469_v9  ;;  %v1479_v49 = vshll.u32 %v4012_v35, 16  ;;  %v1474_v54 = vshll.u32 %v4629_v39, 16  ;;  %v201_v41 = vld [vmem:[%s4389_s19 + $0x48] sm:$0xf]  ;;  %v202_v63 = vld [vmem:[%s4389_s19 + $0x4c] sm:$0xf]  ;;  %v3328_v9 = vcombine.low %v3168_v45, %v4529_v53 }
  0x44   : > { %v583_v46 = vrot.slane %v581_v34, 1  ;;  %v3129_v3 = vld [vmem:[%s4389_s19 + $0x54] sm:$0xf]  ;;  %v4641_v4 = vcombine.low %v201_v41, %v202_v63  ;;  %v4017_v6 = vld [vmem:[%s4389_s19 + $0x50] ss:$0 sps:$4 sm:$0x11]   ;;  %v1247_v28 = vsel %vm790_vm1, %v1245_v56, %v1246_v62 }
  0x45   : > { %1639 = vrot.lane.b32.xlu0 %v1458_v50, %s4291_s26  ;;  %v588_v50 = vrot.slane %v586_v8, 1  ;;  %v1481_v61 = vrot.slane %v1479_v49, 1  ;;  %v1476_v1 = vrot.slane %v1474_v54, 1  ;;  %v3187_v12 = vld [vmem:[%s4389_s19 + $0x3c] sm:$0xf]  ;;  %v598_v23 = vshll.u32 %v4017_v6, 16 }
  0x46   : > { %1287 = vrot.lane.b32.xlu1 %v1241_v52, %s4291_s26  ;;  %v1472_v52 = vshrl.u32 %v4629_v39, 16  ;;  %v584_v59 = vor.u32 %v583_v46, %v579_v33  ;;  %v4648_v16 = vld [vmem:[%s4389_s19 + $0x58] sm:$0xf]  ;;  %v3188_v17 = vld [vmem:[%s4389_s19 + $0x40] sm:$0xf]  ;;  %v591_v19 = vshrl.u32 %v4641_v4, 16 }
  0x47   : > { %v593_v21 = vshll.u32 %v4641_v4, 16  ;;  %v4019_v26 = vld [vmem:[%s4389_s19 + $0x44] ss:$0 sps:$4 sm:$0x11]   ;;  %v4656_v53 = vcombine.low %v3187_v12, %v3188_v17  ;;  %v600_v31 = vrot.slane %v598_v23, 1  ;;  %v4663_v35 = vcombine.low %v3129_v3, %v4648_v16 }
  0x48   : > { %v589_v15 = vsel %vm517_vm0, %v584_v59, %v588_v50  ;;  %v1477_v18 = vor.u32 %v1476_v1, %v1472_v52  ;;  %v4020_v33 = vld [vmem:[%s4389_s19 + $0x38] ss:$0 sps:$4 sm:$0x11]   ;;  %v3169_v34 = vld [vmem:[%s4389_s19 + $0x3c] sm:$0xe]  ;;  %v1248_v45 = vrot.slane %v3328_v9, 1 }
  0x49   : > { %927 = vrot.lane.b32.xlu0 %v4589_v58, %s4291_s26  ;;  %5689 = vst [vmem:[#allocation5_spill] sm:$0xff] %v4656_v53  ;;  %5690 = vst [vmem:[#allocation6_spill] sm:$0xff] %v4663_v35  ;;  %v1486_v8 = vshll.u32 %v4656_v53, 16  ;;  %v203_v46 = vld [vmem:[%s4389_s19 + $0x54] sm:$0xf]  ;;  %v3329_v54 = vcombine.low %v3169_v34, %v4571_v40  ;;  %v1249_v41 = vrot.slane %v4020_v33, 1 }
  0x4a   : > { %718 = vrot.lane.b32.xlu1 %v577_v30, %s4291_s26  ;;  %v1482_v29 = vsel %vm517_vm0, %v1477_v18, %v1481_v61  ;;  %v595_v30 = vrot.slane %v593_v21, 1  ;;  %v204_v52 = vld [vmem:[%s4389_s19 + $0x58] sm:$0xf]  ;;  %v3131_v59 = vld [vmem:[%s4389_s19 + $0x60] sm:$0xf] }
  0x4b   : > { %v1488_v49 = vrot.slane %v1486_v8, 1  ;;  %v4674_v61 = vld [vmem:[%s4389_s19 + $0x64] sm:$0xf]  ;;  %v4676_v62 = vcombine.low %v203_v46, %v204_v52  ;;  %v4024_v63 = vld [vmem:[%s4389_s19 + $0x5c] ss:$0 sps:$4 sm:$0x11]   ;;  %v1250_v21 = vsel %vm790_vm1, %v1248_v45, %v1249_v41 }
  0x4c   : > { %v596_v44 = vor.u32 %v595_v30, %v591_v19  ;;  %v3189_v3 = vld [vmem:[%s4389_s19 + $0x48] sm:$0xf]  ;;  %v3190_v6 = vld [vmem:[%s4389_s19 + $0x4c] sm:$0xf]  ;;  %v610_v9 = vshll.u32 %v4024_v63, 16  ;;  %v4695_v30 = vcombine.low %v3131_v59, %v4674_v61 }
  0x4d   : > { %1641 = vrot.lane.b32.xlu0 %v1470_v32, %s4291_s26  ;;  %v1491_v32 = vshll.u32 %v4019_v26, 16  ;;  %5691 = vst [vmem:[#allocation7_spill] sm:$0xff] %v4676_v62  ;;  %v603_v40 = vshrl.u32 %v4676_v62, 16  ;;  %v605_v12 = vshll.u32 %v4676_v62, 16  ;;  %v4687_v17 = vcombine.low %v3189_v3, %v3190_v6  ;;  %v206_v8 = vld [vmem:[%s4389_s19 + $0x64] sm:$0xf] }
  0x4e   : > { %1289 = vrot.lane.b32.xlu1 %v1244_v36, %s4291_s26  ;;  %v1484_v36 = vshrl.u32 %v4656_v53, 16  ;;  %v601_v56 = vsel %vm517_vm0, %v596_v44, %v600_v31  ;;  %v4026_v18 = vld [vmem:[%s4389_s19 + $0x50] ss:$0 sps:$4 sm:$0x11]   ;;  %v612_v26 = vrot.slane %v610_v9, 1  ;;  %5693 = vst [vmem:[#allocation9_spill] sm:$0xff] %v4695_v30 }
  0x4f   : > { %v1493_v50 = vrot.slane %v1491_v32, 1  ;;  %5692 = vst [vmem:[#allocation8_spill] sm:$0xff] %v4687_v17  ;;  %v4027_v19 = vld [vmem:[%s4389_s19 + $0x44] ss:$0 sps:$4 sm:$0x11]   ;;  %v607_v23 = vrot.slane %v605_v12, 1 }
  0x50   : > { %v1489_v1 = vor.u32 %v1488_v49, %v1484_v36  ;;  %v1496_v31 = vshrl.u32 %v4687_v17, 16  ;;  %v1498_v32 = vshll.u32 %v4687_v17, 16  ;;  %v1503_v33 = vshll.u32 %v4026_v18, 16  ;;  %v205_v36 = vld [vmem:[%s4389_s19 + $0x60] sm:$0xf] }
  0x51   : > { %929 = vrot.lane.b32.xlu0 %v4627_v37, %s4291_s26  ;;  %v608_v34 = vor.u32 %v607_v23, %v603_v40  ;;  %v1252_v46 = vrot.slane %v4027_v19, 1  ;;  %v4702_v49 = vcombine.low %v205_v36, %v206_v8  ;;  %v4709_v41 = vld [vmem:[%s4389_s19 + $0x70] sm:$0xf]  ;;  %v3191_v59 = vld [vmem:[%s4389_s19 + $0x54] sm:$0xf] }
  0x52   : > { %720 = vrot.lane.b32.xlu1 %v589_v15, %s4291_s26  ;;  %v1494_v15 = vsel %vm517_vm0, %v1489_v1, %v1493_v50  ;;  %v1500_v44 = vrot.slane %v1498_v32, 1  ;;  %v1505_v45 = vrot.slane %v1503_v33, 1  ;;  %v4031_v50 = vld [vmem:[%s4389_s19 + $0x68] ss:$0 sps:$4 sm:$0x11]  }
  0x53   : > { %5694 = vst [vmem:[#allocation10_spill] sm:$0xff] %v4702_v49  ;;  %v3192_v63 = vld [vmem:[%s4389_s19 + $0x58] sm:$0xf]  ;;  %v615_v3 = vshrl.u32 %v4702_v49, 16  ;;  %v617_v6 = vshll.u32 %v4702_v49, 16  ;;  %v622_v40 = vshll.u32 %v4031_v50, 16 }
  0x54   : > { %v1501_v1 = vor.u32 %v1500_v44, %v1496_v31  ;;  %v4717_v12 = vcombine.low %v3191_v59, %v3192_v63  ;;  %v4034_v19 = vld [vmem:[%s4389_s19 + $0x50] ss:$0 sps:$4 sm:$0x11]   ;;  %v3171_v33 = vld [vmem:[%s4389_s19 + $0x54] sm:$0xe] }
  0x55   : > { %1643 = vrot.lane.b32.xlu0 %v1482_v29, %s4291_s26  ;;  %v3170_v29 = vld [vmem:[%s4389_s19 + $0x48] sm:$0xe]  ;;  %v619_v18 = vrot.slane %v617_v6, 1  ;;  %v207_v8 = vld [vmem:[%s4389_s19 + $0x6c] sm:$0xf] }
  0x56   : > { %1291 = vrot.lane.b32.xlu1 %v1247_v28, %s4291_s26  ;;  %v1251_v28 = vrot.slane %v3329_v54, 1  ;;  %v3330_v52 = vcombine.low %v3170_v29, %v4608_v20  ;;  %v613_v54 = vsel %vm517_vm0, %v608_v34, %v612_v26  ;;  %5695 = vst [vmem:[#allocation11_spill] sm:$0xff] %v4717_v12  ;;  %v4033_v20 = vld [vmem:[%s4389_s19 + $0x5c] ss:$0 sps:$4 sm:$0x11]   ;;  %v1506_v9 = vsel %vm517_vm0, %v1501_v1, %v1505_v45 }
  0x57   : > { %v1508_v23 = vshrl.u32 %v4717_v12, 16  ;;  %v1510_v26 = vshll.u32 %v4717_v12, 16  ;;  %v1515_v29 = vshll.u32 %v4033_v20, 16  ;;  %v620_v32 = vor.u32 %v619_v18, %v615_v3  ;;  %v208_v44 = vld [vmem:[%s4389_s19 + $0x70] sm:$0xf] }
  0x58   : > { %v1255_v45 = vrot.slane %v4034_v19, 1  ;;  %v4038_v50 = vld [vmem:[%s4389_s19 + $0x74] ss:$0 sps:$4 sm:$0x11]   ;;  %v3135_v59 = vld [vmem:[%s4389_s19 + $0x78] sm:$0xf]  ;;  %v3331_v18 = vcombine.low %v3171_v33, %v4648_v16 }
  0x59   : > { %931 = vrot.lane.b32.xlu0 %v4663_v35, %s4291_s26  ;;  %v1512_v34 = vrot.slane %v1510_v26, 1  ;;  %v1517_v36 = vrot.slane %v1515_v29, 1  ;;  %v4740_v63 = vld [vmem:[%s4389_s19 + $0x7c] sm:$0xf]  ;;  %v3193_v1 = vld [vmem:[%s4389_s19 + $0x60] sm:$0xf] }
  0x5a   : > { %722 = vrot.lane.b32.xlu1 %v601_v56, %s4291_s26  ;;  %v3133_v56 = vld [vmem:[%s4389_s19 + $0x6c] sm:$0xf]  ;;  %v4760_v16 = vcombine.low %v3135_v59, %v4740_v63  ;;  %v251_v12 = vld [vmem:[%s4389_s19 + $0xa8] sm:$0xe] }
  0x5b   : > { %v4728_v31 = vcombine.low %v3133_v56, %v4709_v41  ;;  %v1513_v56 = vor.u32 %v1512_v34, %v1508_v23  ;;  %v4041_v34 = vld [vmem:[%s4389_s19 + $0x5c] ss:$0 sps:$4 sm:$0x11]   ;;  %v3195_v59 = vld [vmem:[%s4389_s19 + $0x6c] sm:$0xf] }
  0x5c   : > { %v4157_v17 = vld [vmem:[%s4389_s19 + $0xac] sm:$0xf] }
  0x5d   : > { %1645 = vrot.lane.b32.xlu0 %v1494_v15, %s4291_s26  ;;  %v1253_v15 = vsel %vm790_vm1, %v1251_v28, %v1252_v46  ;;  %v1254_v28 = vrot.slane %v3330_v52, 1  ;;  %v4734_v46 = vcombine.low %v207_v8, %v208_v44  ;;  %v3194_v52 = vld [vmem:[%s4389_s19 + $0x64] sm:$0xf]  ;;  %v209_v8 = vld [vmem:[%s4389_s19 + $0x78] sm:$0xf] }
  0x5e   : > { %1293 = vrot.lane.b32.xlu1 %v1250_v21, %s4291_s26  ;;  %v624_v21 = vrot.slane %v622_v40, 1  ;;  %v634_v40 = vshll.u32 %v4038_v50, 16  ;;  %v4748_v20 = vcombine.low %v3193_v1, %v3194_v52  ;;  %v210_v50 = vld [vmem:[%s4389_s19 + $0x7c] sm:$0xf] }
  0x5f   : > { %5696 = vst [vmem:[#allocation12_spill] sm:$0xff] %v4734_v46  ;;  %v627_v3 = vshrl.u32 %v4734_v46, 16  ;;  %v629_v6 = vshll.u32 %v4734_v46, 16  ;;  %v1256_v26 = vsel %vm790_vm1, %v1254_v28, %v1255_v45  ;;  %v1257_v45 = vrot.slane %v3331_v18, 1  ;;  %v4780_v18 = vld [vmem:[%s4389_s19 + $0x88] sm:$0xf] }
  0x60   : > { %5697 = vst [vmem:[#allocation13_spill] sm:$0xff] %v4748_v20  ;;  %v1522_v23 = vshll.u32 %v4748_v20, 16  ;;  %v636_v29 = vrot.slane %v634_v40, 1  ;;  %v4045_v1 = vld [vmem:[%s4389_s19 + $0x80] ss:$0 sps:$4 sm:$0x11]  }
  0x61   : > { %933 = vrot.lane.b32.xlu0 %v4695_v30, %s4291_s26  ;;  %v631_v19 = vrot.slane %v629_v6, 1  ;;  %v4768_v6 = vcombine.low %v209_v8, %v210_v50  ;;  %v3137_v40 = vld [vmem:[%s4389_s19 + $0x84] sm:$0xf]  ;;  %v4050_v50 = vld [vmem:[%s4389_s19 + $0x68] ss:$0 sps:$4 sm:$0x11]  }
  0x62   : > { %724 = vrot.lane.b32.xlu1 %v613_v54, %s4291_s26  ;;  %v625_v54 = vsel %vm517_vm0, %v620_v32, %v624_v21  ;;  %v1520_v21 = vshrl.u32 %v4748_v20, 16  ;;  %v4923_v30 = vld [vmem:[%s4389_s19 + $0xac] sm:$0xf] }
  0x63   : > { %v632_v33 = vor.u32 %v631_v19, %v627_v3  ;;  %5698 = vst [vmem:[#allocation14_spill] sm:$0xff] %v4768_v6  ;;  %v3196_v3 = vld [vmem:[%s4389_s19 + $0x70] sm:$0xf]  ;;  %v4049_v19 = vld [vmem:[%s4389_s19 + $0x74] ss:$0 sps:$4 sm:$0x11]  }
  0x65   : > { %1647 = vrot.lane.b32.xlu0 %v1506_v9, %s4291_s26  ;;  %v1518_v9 = vsel %vm517_vm0, %v1513_v56, %v1517_v36  ;;  %v1524_v36 = vrot.slane %v1522_v23, 1  ;;  %v1258_v56 = vrot.slane %v4041_v34, 1  ;;  %v637_v52 = vsel %vm517_vm0, %v632_v33, %v636_v29 }
  0x66   : > { %1295 = vrot.lane.b32.xlu1 %v1253_v15, %s4291_s26  ;;  %v4040_v15 = vld [vmem:[%s4389_s19 + $0x68] ss:$0 sps:$4 sm:$0x11]   ;;  %v639_v23 = vshrl.u32 %v4768_v6, 16  ;;  %v1539_v34 = vshll.u32 %v4049_v19, 16 }
  0x67   : > { %v1527_v32 = vshll.u32 %v4040_v15, 16  ;;  %v1525_v28 = vor.u32 %v1524_v36, %v1520_v21  ;;  %v4775_v15 = vcombine.low %v3195_v59, %v3196_v3  ;;  %v1259_v36 = vsel %vm790_vm1, %v1257_v45, %v1258_v56  ;;  %v212_v59 = vld [vmem:[%s4389_s19 + $0x88] sm:$0xf]  ;;  %v3173_v3 = vld [vmem:[%s4389_s19 + $0x6c] sm:$0xe] }
  0x69   : > { %935 = vrot.lane.b32.xlu0 %v4728_v31, %s4291_s26  ;;  %v1529_v44 = vrot.slane %v1527_v32, 1  ;;  %5699 = vst [vmem:[#allocation15_spill] sm:$0xff] %v4775_v15  ;;  %v1532_v29 = vshrl.u32 %v4775_v15, 16  ;;  %v1534_v32 = vshll.u32 %v4775_v15, 16  ;;  %v3197_v15 = vld [vmem:[%s4389_s19 + $0x78] sm:$0xf] }
  0x6a   : > { %726 = vrot.lane.b32.xlu1 %v625_v54, %s4291_s26  ;;  %v3172_v54 = vld [vmem:[%s4389_s19 + $0x60] sm:$0xe] }
  0x6b   : > { %v1530_v21 = vsel %vm517_vm0, %v1525_v28, %v1529_v44  ;;  %v3332_v33 = vcombine.low %v3172_v54, %v4674_v61  ;;  %v4792_v28 = vcombine.low %v3137_v40, %v4780_v18  ;;  %v1541_v54 = vrot.slane %v1539_v34, 1 }
  0x6d   : > { %1649 = vrot.lane.b32.xlu0 %v1518_v9, %s4291_s26  ;;  %v646_v9 = vshll.u32 %v4045_v1, 16  ;;  %v1536_v1 = vrot.slane %v1534_v32, 1  ;;  %v1260_v40 = vrot.slane %v3332_v33, 1  ;;  %v4804_v32 = vld [vmem:[%s4389_s19 + $0x94] sm:$0xf] }
  0x6e   : > { %1297 = vrot.lane.b32.xlu1 %v1256_v26, %s4291_s26  ;;  %v641_v26 = vshll.u32 %v4768_v6, 16  ;;  %v3198_v6 = vld [vmem:[%s4389_s19 + $0x7c] sm:$0xf] }
  0x6f   : > { %v648_v44 = vrot.slane %v646_v9, 1  ;;  %v1537_v45 = vor.u32 %v1536_v1, %v1532_v29  ;;  %v4056_v9 = vld [vmem:[%s4389_s19 + $0x8c] ss:$0 sps:$4 sm:$0x11]   ;;  %v3174_v1 = vld [vmem:[%s4389_s19 + $0x78] sm:$0xe] }
  0x70   : > { %v643_v8 = vrot.slane %v641_v26, 1  ;;  %v3139_v26 = vld [vmem:[%s4389_s19 + $0x90] sm:$0xf]  ;;  %v658_v34 = vshll.u32 %v4056_v9, 16 }
  0x71   : > { %937 = vrot.lane.b32.xlu0 %v4760_v16, %s4291_s26  ;;  %v1542_v33 = vsel %vm517_vm0, %v1537_v45, %v1541_v54 }
  0x72   : > { %728 = vrot.lane.b32.xlu1 %v637_v52, %s4291_s26  ;;  %v211_v52 = vld [vmem:[%s4389_s19 + $0x84] sm:$0xf]  ;;  %v644_v61 = vor.u32 %v643_v8, %v639_v23  ;;  %v3333_v8 = vcombine.low %v3173_v3, %v4709_v41  ;;  %v4824_v41 = vld [vmem:[%s4389_s19 + $0x74] ss:$0 sps:$4 sm:$0x11]  }
  0x73   : > { %v4798_v56 = vcombine.low %v211_v52, %v212_v59  ;;  %v660_v59 = vrot.slane %v658_v34, 1 }
  0x74   : > { %v649_v19 = vsel %vm517_vm0, %v644_v61, %v648_v44  ;;  %v4815_v44 = vcombine.low %v3197_v15, %v3198_v6  ;;  %v4828_v6 = vcombine.low %v3139_v26, %v4804_v32  ;;  %v1263_v45 = vrot.slane %v3333_v8, 1 }
  0x75   : > { %1651 = vrot.lane.b32.xlu0 %v1530_v21, %s4291_s26  ;;  %5700 = vst [vmem:[#allocation16_spill] sm:$0xff] %v4798_v56  ;;  %v1261_v21 = vrot.slane %v4050_v50, 1  ;;  %v651_v23 = vshrl.u32 %v4798_v56, 16  ;;  %v653_v29 = vshll.u32 %v4798_v56, 16 }
  0x76   : > { %1299 = vrot.lane.b32.xlu1 %v1259_v36, %s4291_s26  ;;  %v1002_v36 = vshll.u32 %v4403_v11, 16  ;;  %5701 = vst [vmem:[#allocation17_spill] sm:$0xff] %v4815_v44  ;;  %v4061_v50 = vld [vmem:[%s4389_s19 + $0x80] ss:$0 sps:$4 sm:$0x11]   ;;  %v1544_v56 = vshrl.u32 %v4815_v44, 16 }
  0x77   : > { %v655_v52 = vrot.slane %v653_v29, 1  ;;  %v1262_v61 = vsel %vm790_vm1, %v1260_v40, %v1261_v21  ;;  %v1546_v9 = vshll.u32 %v4815_v44, 16  ;;  %v1551_v20 = vshll.u32 %v4061_v50, 16  ;;  %v3199_v40 = vld [vmem:[%s4389_s19 + $0x84] sm:$0xf] }
  0x78   : > { %v3334_v21 = vcombine.low %v3174_v1, %v4740_v63  ;;  %v3175_v50 = vld [vmem:[%s4389_s19 + $0x84] sm:$0xe]  ;;  %v4843_v8 = vrot.slane %v1002_v36, 1  ;;  %v4847_v63 = vld [vmem:[%s4389_s19 + $0x80] ss:$0 sps:$4 sm:$0x11]  }
  0x79   : > { %939 = vrot.lane.b32.xlu0 %v4792_v28, %s4291_s26  ;;  %v656_v15 = vor.u32 %v655_v52, %v651_v23  ;;  %v1548_v3 = vrot.slane %v1546_v9, 1  ;;  %v1553_v54 = vrot.slane %v1551_v20, 1  ;;  %v4068_v23 = vld [vmem:[%s4389_s19 + $0x8c] ss:$0 sps:$4 sm:$0x11]  }
  0x7a   : > { %730 = vrot.lane.b32.xlu1 %v649_v19, %s4291_s26  ;;  %v1264_v19 = vrot.slane %v4824_v41, 1 }
  0x7b   : > { %v661_v29 = vsel %vm517_vm0, %v656_v15, %v660_v59  ;;  %v1549_v34 = vor.u32 %v1548_v3, %v1544_v56  ;;  %v1563_v59 = vshll.u32 %v4068_v23, 16  ;;  %v1266_v15 = vrot.slane %v3334_v21, 1  ;;  %v4146_v21 = vld [vmem:[%s4389_s19 + $0x8] ss:$0 sps:$4 sm:$0x11]  }
  0x7c   : > { %v1265_v36 = vsel %vm790_vm1, %v1263_v45, %v1264_v19  ;;  %v1267_v3 = vrot.slane %v4847_v63, 1  ;;  %v4075_v19 = vld [vmem:[%s4389_s19 + $0x98] ss:$0 sps:$4 sm:$0x11]  }
  0x7d   : > { %1653 = vrot.lane.b32.xlu0 %v1542_v33, %s4291_s26  ;;  %v3200_v33 = vld [vmem:[%s4389_s19 + $0x88] sm:$0xf]  ;;  %v1554_v52 = vsel %vm517_vm0, %v1549_v34, %v1553_v54  ;;  %v3201_v34 = vld [vmem:[%s4389_s19 + $0x90] sm:$0xf]  ;;  %v1575_v26 = vshll.u32 %v4075_v19, 16 }
  0x7e   : > { %1301 = vrot.lane.b32.xlu1 %v1262_v61, %s4291_s26  ;;  %v4840_v20 = vcombine.low %v3199_v40, %v3200_v33  ;;  %v4145_v61 = vld [vmem:[%s4389_s19 + $0x98] ss:$0 sps:$4 sm:$0x11]   ;;  %v1565_v40 = vrot.slane %v1563_v59, 1  ;;  %v3202_v33 = vld [vmem:[%s4389_s19 + $0x94] sm:$0xf] }
  0x7f   : > { %v828_v9 = vrot.slane %v4145_v61, 1  ;;  %v4860_v45 = vcombine.low %v3201_v34, %v3202_v33  ;;  %v792_v61 = vrot.slane %v4146_v21, 1  ;;  %v3176_v59 = vld [vmem:[%s4389_s19 + $0x90] sm:$0xe] }
  0x80   : > { %5702 = vst [vmem:[#allocation18_spill] sm:$0xff] %v4840_v20  ;;  %v1556_v56 = vshrl.u32 %v4840_v20, 16  ;;  %v1558_v1 = vshll.u32 %v4840_v20, 16  ;;  %v4873_v34 = vld [vmem:[%s4389_s19 + $0x8c] ss:$0 sps:$4 sm:$0x11]  }
  0x81   : > { %941 = vrot.lane.b32.xlu0 %v4828_v6, %s4291_s26  ;;  %5703 = vst [vmem:[#allocation19_spill] sm:$0xff] %v4860_v45  ;;  %v1270_v19 = vrot.slane %v4873_v34, 1 }
  0x82   : > { %732 = vrot.lane.b32.xlu1 %v661_v29, %s4291_s26  ;;  %v1560_v54 = vrot.slane %v1558_v1, 1  ;;  %v3335_v29 = vcombine.low %v3175_v50, %v4780_v18  ;;  %v249_v1 = vld [vmem:[%s4389_s19 + $0x90] sm:$0xe]  ;;  %v1568_v50 = vshrl.u32 %v4860_v45, 16 }
  0x84   : > { %v1561_v23 = vor.u32 %v1560_v54, %v1556_v56  ;;  %v4147_v56 = vld [vmem:[%s4389_s19 + $0x94] sm:$0xf]  ;;  %v1269_v33 = vrot.slane %v3335_v29, 1 }
  0x85   : > { %1655 = vrot.lane.b32.xlu0 %v1554_v52, %s4291_s26  ;;  %v1268_v52 = vsel %vm790_vm1, %v1266_v15, %v1267_v3  ;;  %v3289_v54 = vcombine.low %v249_v1, %v4147_v56  ;;  %v3177_v15 = vld [vmem:[%s4389_s19 + $0x9c] sm:$0xe]  ;;  %v3336_v56 = vcombine.low %v3176_v59, %v4804_v32 }
  0x86   : > { %1303 = vrot.lane.b32.xlu1 %v1265_v36, %s4291_s26  ;;  %v1566_v18 = vsel %vm517_vm0, %v1561_v23, %v1565_v40  ;;  %v1570_v36 = vshll.u32 %v4860_v45, 16  ;;  %v1577_v40 = vrot.slane %v1575_v26, 1  ;;  %v237_v23 = vld [vmem:[%s4389_s19] sm:$0xe]  ;;  %v4148_v45 = vld [vmem:[%s4389_s19 + $0x4] sm:$0xf]  ;;  %v1271_v44 = vsel %vm790_vm1, %v1269_v33, %v1270_v19 }
  0x87   : > { %v827_v21 = vrot.slane %v3289_v54, 1  ;;  %v3203_v1 = vld [vmem:[%s4389_s19 + $0x9c] sm:$0xf]  ;;  %v1272_v19 = vrot.slane %v3336_v56, 1 }
  0x88   : > { %v1572_v3 = vrot.slane %v1570_v36, 1  ;;  %v4885_v36 = vld [vmem:[%s4389_s19 + $0xa0] sm:$0xf] }
  0x89   : > { %1657 = vrot.lane.b32.xlu0 %v1566_v18, %s4291_s26  ;;  %v3277_v18 = vcombine.low %v237_v23, %v4148_v45  ;;  %v829_v29 = vsel %vm790_vm1, %v827_v21, %v828_v9  ;;  %v4890_v46 = vcombine.low %v3203_v1, %v4885_v36  ;;  %v4893_v45 = vld [vmem:[%s4389_s19 + $0xa4] ss:$0 sps:$4 sm:$0x11]   ;;  %v4150_v9 = vld [vmem:[%s4389_s19 + $0xa0] sm:$0xf] }
  0x8a   : > { %1305 = vrot.lane.b32.xlu1 %v1268_v52, %s4291_s26  ;;  %v1573_v20 = vor.u32 %v1572_v3, %v1568_v50  ;;  %v4149_v50 = vld [vmem:[%s4389_s19 + $0xa4] ss:$0 sps:$4 sm:$0x11]   ;;  %v3337_v59 = vcombine.low %v3177_v15, %v4150_v9  ;;  %v1587_v21 = vshll.u32 %v4893_v45, 16  ;;  %v3178_v1 = vld [vmem:[%s4389_s19 + $0xa8] sm:$0xe] }
  0x8b   : > { %v791_v52 = vrot.slane %v3277_v18, 1  ;;  %5704 = vst [vmem:[#allocation20_spill] sm:$0xff] %v4890_v46  ;;  %v831_v32 = vrot.slane %v4149_v50, 1  ;;  %v1582_v23 = vshll.u32 %v4890_v46, 16  ;;  %v250_v18 = vld [vmem:[%s4389_s19 + $0x9c] sm:$0xe] }
  0x8c   : > { %v1578_v54 = vsel %vm517_vm0, %v1573_v20, %v1577_v40  ;;  %v1580_v40 = vshrl.u32 %v4890_v46, 16  ;;  %v4905_v15 = vld [vmem:[%s4389_s19 + $0x98] ss:$0 sps:$4 sm:$0x11]   ;;  %v238_v50 = vld [vmem:[%s4389_s19 + $0xc] sm:$0xe] }
  0x8d   : > { %1659 = vrot.lane.b32.xlu0 %v1578_v54, %s4291_s26  ;;  %v1273_v54 = vrot.slane %v4905_v15, 1  ;;  %v4152_v9 = vld [vmem:[%s4389_s19 + $0x14] ss:$0 sps:$4 sm:$0x11]  }
  0x8e   : > { %1307 = vrot.lane.b32.xlu1 %v1271_v44, %s4291_s26  ;;  %v793_v44 = vsel %vm790_vm1, %v791_v52, %v792_v61  ;;  %v1584_v61 = vrot.slane %v1582_v23, 1  ;;  %v4151_v52 = vld [vmem:[%s4389_s19 + $0xa0] sm:$0xf]  ;;  %v1275_v23 = vrot.slane %v3337_v59, 1 }
  0x8f   : > { %v4931_v59 = vld [vmem:[%s4389_s19 + $0xb0] ss:$0 sps:$4 sm:$0x11]  }
  0x90   : > { %v1585_v56 = vor.u32 %v1584_v61, %v1580_v40  ;;  %5706 = vst [vmem:[#allocation22_spill] sm:$0xff] %v4931_v59  ;;  %v4934_v61 = vld [vmem:[%s4389_s19 + $0xb0] ss:$0 sps:$4 sm:$0x11]  }
  0x92   : > { %v944_v26 = vpop.permute.xlu0 %943 }
  0x93   : > { %v920_v33 = vpop.permute.xlu1 %919  ;;  %v1866_v20 = vsel %vm1767_vm2, %v829_v29, %v944_v26  ;;  %v1589_v29 = vrot.slane %v1587_v21, 1  ;;  %v3290_v26 = vcombine.low %v250_v18, %v4151_v52  ;;  %v4085_v21 = vld [vmem:[%s5661_s1 + $0xc8] sm:$0xff]   ;;  %v1274_v18 = vsel %vm790_vm1, %v1272_v19, %v1273_v54  ;;  %v4153_v52 = vld [vmem:[%s4389_s19 + $0x10] sm:$0xf] }
  0x94   : > { %2463 = vmatprep.mubr.bf16.mxu1 %v1866_v20  ;;  %v1818_v3 = vsel %vm1767_vm2, %v793_v44, %v920_v33  ;;  %v795_v33 = vrot.slane %v4152_v9, 1  ;;  %v4081_v20 = vld [vmem:[%s5661_s1 + $0x80] sm:$0xff]   ;;  %v3278_v46 = vcombine.low %v238_v50, %v4153_v52  ;;  %1309 = vrot.lane.b32.xlu1 %v1274_v18, %s4291_s26  ;;  %v4155_v19 = vld [vmem:[%s4389_s19 + $0xac] sm:$0xf] }
  0x95   : > { %2367 = vmatprep.mubr.bf16.mxu0 %v1818_v3  ;;  %v830_v44 = vrot.slane %v3290_v26, 1  ;;  %v3205_v3 = vld [vmem:[%s4389_s19 + $0xa8] sm:$0xf]  ;;  %v1590_v9 = vsel %vm517_vm0, %v1585_v56, %v1589_v29  ;;  %v3338_v54 = vcombine.low %v3178_v1, %v4155_v19  ;;  %v4947_v52 = vld [vmem:[%s4389_s19 + $0xa4] ss:$0 sps:$4 sm:$0x11]  }
  0x96   : > { %v4928_v40 = vcombine.low %v3205_v3, %v4923_v30  ;;  %1661 = vrot.lane.b32.xlu0 %v1590_v9, %s4291_s26  ;;  %v4086_v56 = vld [vmem:[%s5661_s1 + $0x88] sm:$0xff]   ;;  %v4950_v26 = vld [vmem:[%s4389_s19 + $0x20] ss:$0 sps:$4 sm:$0x11]   ;;  %v794_v19 = vrot.slane %v3278_v46, 1  ;;  %v1276_v35 = vrot.slane %v4947_v52, 1 }
  0x97   : > { %v832_v9 = vsel %vm790_vm1, %v830_v44, %v831_v32  ;;  %v239_v1 = vld [vmem:[%s4389_s19 + $0x18] sm:$0xe]  ;;  %v4964_v62 = vrot.slane %v3338_v54, 1 }
  0x98   : > { %5705 = vst [vmem:[#allocation21_spill] sm:$0xff] %v4928_v40  ;;  %v1592_v3 = vshrl.u32 %v4928_v40, 16  ;;  %v1594_v18 = vshll.u32 %v4928_v40, 16  ;;  %v796_v54 = vsel %vm790_vm1, %v794_v19, %v795_v33 }
  0x9a   : > { %v1596_v40 = vrot.slane %v1594_v18, 1  ;;  %v4091_v18 = vld [vmem:[%s5661_s1 + $0x90] sm:$0xff]  }
  0x9b   : > { %v735_v50 = vpop.permute.xlu0 %734 }
  0x9c   : > { %v1805_v29 = vsel %vm1767_vm2, %v4409_v14, %v735_v50  ;;  %v4089_v14 = vld [vmem:[%s5661_s1 + $0xd0] sm:$0xff]   ;;  %v1599_v50 = vshll.u32 %v4931_v59, 16  ;;  %v711_v49 = vpop.permute.xlu1 %710  ;;  %v1597_v53 = vor.u32 %v1596_v40, %v1592_v3  ;;  %v4094_v40 = vld [vmem:[%s5661_s1 + $0xd8] sm:$0xff]  }
  0x9d   : > { %2464 = vmatmul.mubr.bf16.vlgmr.msra.gmra.mrb[0].mxu1 %v1805_v29  ;;  %v3291_v29 = vcombine.low %v251_v12, %v4157_v17  ;;  %v1769_v32 = vsel %vm1767_vm2, %v4421_v22, %v711_v49  ;;  %v1277_v17 = vsel %vm790_vm1, %v1275_v23, %v1276_v35  ;;  %v4158_v12 = vld [vmem:[%s4389_s19 + $0x1c] sm:$0xf]  ;;  %v3207_v22 = vld [vmem:[%s4389_s19 + $0xb4] sm:$0xf]  ;;  %v4974_v49 = vld [vmem:[%s4389_s19 + $0xb8] sm:$0xf] }
  0x9e   : > { %3720 = vmatpush3.bf16.msra.mxu1 %v4081_v20  ;;  %v1601_v46 = vrot.slane %v1599_v50, 1  ;;  %2368 = vmatmul.mubr.bf16.vlgmr.msra.gmra.mrb[0].mxu0 %v1769_v32  ;;  %v3279_v59 = vcombine.low %v239_v1, %v4158_v12  ;;  %v4985_v35 = vcombine.low %v3207_v22, %v4974_v49  ;;  %v4988_v23 = vld [vmem:[%s4389_s19 + $0xbc] ss:$0 sps:$4 sm:$0x11]   ;;  %v4991_v1 = vld [vmem:[%s4389_s19 + $0xb4] sm:$0xe] }
  0x9f   : > { %v946_v44 = vpop.permute.xlu0 %945  ;;  %3721 = vmatprep.subr.bf16.mxu1 %v4085_v21  ;;  %v4113_v21 = vld [vmem:[%s5661_s1 + $0x108] sm:$0xff]   ;;  %3852 = vmatpush3.bf16.msra.mxu0 %v4601_v10  ;;  %v833_v3 = vrot.slane %v3291_v29, 1  ;;  %5708 = vst [vmem:[#allocation24_spill] sm:$0xff] %v4988_v23  ;;  %v1611_v29 = vshll.u32 %v4988_v23, 16  ;;  %v4095_v32 = vld [vmem:[%s5661_s1 + $0x98] sm:$0xff]  }
  0xa0   : > { %v1870_v20 = vsel %vm1767_vm2, %v832_v9, %v946_v44  ;;  %5707 = vst [vmem:[#allocation23_spill] sm:$0xff] %v4985_v35  ;;  %v1602_v9 = vsel %vm517_vm0, %v1597_v53, %v1601_v46  ;;  %1311 = vrot.lane.b32.xlu1 %v1277_v17, %s4291_s26  ;;  %v737_v10 = vpop.permute.xlu1 %736  ;;  %v1604_v19 = vshrl.u32 %v4985_v35, 16  ;;  %v1606_v50 = vshll.u32 %v4985_v35, 16  ;;  %v5011_v46 = vld [vmem:[%s4389_s19 + $0xb0] ss:$0 sps:$4 sm:$0x11]   ;;  %3853 = vmatprep.subr.bf16.mxu0 %v4113_v21 }
  0xa1   : > { %2471 = vmatprep.mubr.bf16.mxu1 %v1870_v20  ;;  %1663 = vrot.lane.b32.xlu0 %v1602_v9, %s4291_s26  ;;  %v797_v44 = vrot.slane %v3279_v59, 1  ;;  %v5709_v20 = vrot.slane %v4934_v61, 1  ;;  %v1613_v22 = vrot.slane %v1611_v29, 1  ;;  %v5021_v59 = vld [vmem:[%s4389_s19 + $0xc0] sm:$0xe]  ;;  %v1279_v9 = vrot.slane %v5011_v46, 1 }
  0xa2   : > { %3722 = vmatpush3.bf16.msra.mxu1 %v4086_v56  ;;  %v5002_v56 = vld [vmem:[%s5661_s1 + $0x110] sm:$0xff]   ;;  %v1608_v12 = vrot.slane %v1606_v50, 1  ;;  %v240_v61 = vld [vmem:[%s4389_s19 + $0x24] sm:$0xe]  ;;  %v3209_v23 = vld [vmem:[%s4389_s19 + $0xc0] sm:$0xf] }
  0xa3   : > { %v922_v33 = vpop.permute.xlu0 %921  ;;  %3723 = vmatprep.subr.bf16.mxu1 %v4089_v14  ;;  %v1808_v14 = vsel %vm1767_vm2, %v4434_v38, %v737_v10  ;;  %v835_v17 = vsel %vm790_vm1, %v833_v3, %v5709_v20  ;;  %v4098_v38 = vld [vmem:[%s5661_s1 + $0xe0] sm:$0xff]   ;;  %v4159_v10 = vld [vmem:[%s4389_s19 + $0xb8] sm:$0xf]  ;;  %3854 = vmatpush3.bf16.msra.mxu0 %v4113_v21 }
  0xa4   : > { %v1822_v53 = vsel %vm1767_vm2, %v796_v54, %v922_v33  ;;  %v252_v54 = vld [vmem:[%s4389_s19 + $0xb4] sm:$0xe]  ;;  %v4161_v3 = vld [vmem:[%s4389_s19 + $0xb8] sm:$0xf]  ;;  %v713_v35 = vpop.permute.xlu1 %712  ;;  %v1609_v29 = vor.u32 %v1608_v12, %v1604_v19  ;;  %3855 = vmatprep.subr.bf16.mxu0 %v5002_v56  ;;  %v5043_v19 = vld [vmem:[%s4389_s19 + $0xc4] sm:$0xf] }
  0xa5   : > { %2375 = vmatprep.mubr.bf16.mxu0 %v1822_v53  ;;  %2472 = vmatmul.mubr.bf16.gmra.mrb[4].mxu1 %v1808_v14  ;;  %v3292_v33 = vcombine.low %v252_v54, %v4159_v10  ;;  %v4160_v53 = vld [vmem:[%s4389_s19 + $0xbc] ss:$0 sps:$4 sm:$0x11]   ;;  %v3339_v20 = vcombine.low %v4991_v1, %v4161_v3  ;;  %v5710_v10 = vrot.slane %v4950_v26, 1  ;;  %v4100_v1 = vld [vmem:[%s5661_s1 + $0xa0] sm:$0xff]   ;;  %v5051_v12 = vcombine.low %v3209_v23, %v5043_v19 }
  0xa6   : > { %3724 = vmatpush3.bf16.msra.mxu1 %v4091_v18  ;;  %v837_v14 = vrot.slane %v4160_v53, 1  ;;  %v1772_v18 = vsel %vm1767_vm2, %v4452_v51, %v713_v35  ;;  %v4126_v51 = vld [vmem:[%s5661_s1 + $0x118] sm:$0xff]   ;;  %v1614_v26 = vsel %vm517_vm0, %v1609_v29, %v1613_v22  ;;  %v5054_v53 = vld [vmem:[%s4389_s19 + $0xc8] ss:$0 sps:$4 sm:$0x11]  }
  0xa7   : > { %v948_v50 = vpop.permute.xlu0 %947  ;;  %3725 = vmatprep.subr.bf16.mxu1 %v4094_v40  ;;  %v799_v21 = vsel %vm790_vm1, %v797_v44, %v5710_v10  ;;  %v1280_v40 = vsel %vm790_vm1, %v4964_v62, %v1279_v9  ;;  %2376 = vmatmul.mubr.bf16.gmra.mrb[4].mxu0 %v1772_v18  ;;  %v836_v35 = vrot.slane %v3292_v33, 1  ;;  %v4163_v62 = vld [vmem:[%s4389_s19 + $0xc4] sm:$0xf]  ;;  %v4103_v22 = vld [vmem:[%s5661_s1 + $0xe8] sm:$0xff]   ;;  %v1616_v23 = vshrl.u32 %v5051_v12, 16 }
  0xa8   : > { %v1874_v54 = vsel %vm1767_vm2, %v835_v17, %v948_v50  ;;  %v4162_v17 = vld [vmem:[%s4389_s19 + $0x28] sm:$0xf]  ;;  %1665 = vrot.lane.b32.xlu0 %v1614_v26, %s4291_s26  ;;  %v3340_v9 = vcombine.low %v5021_v59, %v4163_v62  ;;  %v739_v3 = vpop.permute.xlu1 %738  ;;  %1313 = vrot.lane.b32.xlu1 %v1280_v40, %s4291_s26  ;;  %v1618_v33 = vshll.u32 %v5051_v12, 16  ;;  %v4164_v29 = vld [vmem:[%s4389_s19 + $0x2c] ss:$0 sps:$4 sm:$0x11]  }
  0xa9   : > { %2479 = vmatprep.mubr.bf16.mxu1 %v1874_v54  ;;  %v3280_v44 = vcombine.low %v240_v61, %v4162_v17  ;;  %v1811_v59 = vsel %vm1767_vm2, %v4467_v2, %v739_v3  ;;  %v801_v18 = vrot.slane %v4164_v29, 1  ;;  %v1281_v54 = vrot.slane %v3339_v20, 1  ;;  %3856 = vmatpush3.bf16.msra.mxu0 %v5002_v56  ;;  %v5079_v17 = vld [vmem:[%s4389_s19 + $0xbc] ss:$0 sps:$4 sm:$0x11]  }
  0xaa   : > { %3726 = vmatpush3.bf16.msra.mxu1 %v4095_v32  ;;  %v1623_v32 = vshll.u32 %v5054_v53, 16  ;;  %v838_v10 = vsel %vm790_vm1, %v836_v35, %v837_v14  ;;  %v1620_v40 = vrot.slane %v1618_v33, 1  ;;  %v3211_v20 = vld [vmem:[%s4389_s19 + $0xcc] sm:$0xf]  ;;  %v5083_v56 = vld [vmem:[%s4389_s19 + $0xd0] sm:$0xf]  ;;  %3857 = vmatprep.subr.bf16.mxu0 %v4126_v51 }
  0xab   : > { %v924_v50 = vpop.permute.xlu0 %923  ;;  %3727 = vmatprep.subr.bf16.mxu1 %v4098_v38  ;;  %v4104_v38 = vld [vmem:[%s5661_s1 + $0xa8] sm:$0xff]   ;;  %v800_v2 = vrot.slane %v3280_v44, 1  ;;  %v1282_v35 = vrot.slane %v5079_v17, 1  ;;  %v5088_v44 = vcombine.low %v3211_v20, %v5083_v56  ;;  %v5091_v33 = vld [vmem:[%s4389_s19 + $0xd4] ss:$0 sps:$4 sm:$0x11]  }
  0xac   : > { %v1826_v61 = vsel %vm1767_vm2, %v799_v21, %v924_v50  ;;  %v4107_v21 = vld [vmem:[%s5661_s1 + $0xf0] sm:$0xff]   ;;  %v1625_v26 = vrot.slane %v1623_v32, 1  ;;  %v715_v62 = vpop.permute.xlu1 %714  ;;  %v1621_v14 = vor.u32 %v1620_v40, %v1616_v23  ;;  %v5098_v29 = vld [vmem:[%s4389_s19 + $0xc8] ss:$0 sps:$4 sm:$0x11]   ;;  %v1284_v20 = vrot.slane %v3340_v9, 1 }
  0xad   : > { %2383 = vmatprep.mubr.bf16.mxu0 %v1826_v61  ;;  %2480 = vmatmul.mubr.bf16.gmra.mrb[8].mxu1 %v1811_v59  ;;  %v241_v50 = vld [vmem:[%s4389_s19 + $0x30] sm:$0xe]  ;;  %5711 = vst [vmem:[#allocation25_spill] sm:$0xff] %v5088_v44  ;;  %v4165_v61 = vld [vmem:[%s4389_s19 + $0x14] ss:$0 sps:$4 sm:$0x11]  }
  0xae   : > { %3728 = vmatpush3.bf16.msra.mxu1 %v4100_v1  ;;  %v1775_v1 = vsel %vm1767_vm2, %v4491_v24, %v715_v62  ;;  %v1007_v59 = vshll.u32 %v4165_v61, 16  ;;  %3858 = vmatpush3.bf16.msra.mxu0 %v4126_v51  ;;  %v4109_v23 = vld [vmem:[%s5661_s1 + $0xb0] sm:$0xff]   ;;  %v1626_v40 = vsel %vm517_vm0, %v1621_v14, %v1625_v26  ;;  %v1283_v24 = vsel %vm790_vm1, %v1281_v54, %v1282_v35  ;;  %v4112_v9 = vld [vmem:[%s5661_s1 + $0xf8] sm:$0xff]  }
  0xaf   : > { %v950_v3 = vpop.permute.xlu0 %949  ;;  %3729 = vmatprep.subr.bf16.mxu1 %v4103_v22  ;;  %2384 = vmatmul.mubr.bf16.gmra.mrb[8].mxu0 %v1775_v1  ;;  %v802_v22 = vsel %vm790_vm1, %v800_v2, %v801_v18  ;;  %v1630_v51 = vshll.u32 %v5088_v44, 16  ;;  %v1635_v62 = vshll.u32 %v5091_v33, 16  ;;  %v1285_v18 = vrot.slane %v5098_v29, 1 }
  0xb0   : > { %v1878_v32 = vsel %vm1767_vm2, %v838_v10, %v950_v3  ;;  %1667 = vrot.lane.b32.xlu0 %v1626_v40, %s4291_s26  ;;  %v1628_v10 = vshrl.u32 %v5088_v44, 16  ;;  %v1146_v2 = vshll.u32 %v4393_v7, 16  ;;  %v741_v3 = vpop.permute.xlu1 %740  ;;  %1315 = vrot.lane.b32.xlu1 %v1283_v24, %s4291_s26  ;;  %v1158_v61 = vshll.u32 %v4442_v43, 16 }
  0xb1   : > { %2487 = vmatprep.mubr.bf16.mxu1 %v1878_v32  ;;  %v1814_v14 = vsel %vm1767_vm2, %v4513_v42, %v741_v3  ;;  %v1632_v35 = vrot.slane %v1630_v51, 1  ;;  %v1637_v32 = vrot.slane %v1635_v62, 1  ;;  %v1009_v44 = vrot.slane %v1007_v59, 1  ;;  %v4114_v42 = vld [vmem:[%s5661_s1 + $0xb8] sm:$0xff]  }
  0xb2   : > { %3730 = vmatpush3.bf16.msra.mxu1 %v4104_v38  ;;  %v4166_v38 = vld [vmem:[%s4389_s19 + $0x34] sm:$0xf]  ;;  %v1286_v24 = vsel %vm790_vm1, %v1284_v20, %v1285_v18  ;;  %v1098_v51 = vshll.u32 %v4728_v31, 16  ;;  %v1110_v59 = vshll.u32 %v4760_v16, 16  ;;  %v5138_v18 = vrot.slane %v1146_v2, 1 }
  0xb3   : > { %v926_v1 = vpop.permute.xlu0 %925  ;;  %3731 = vmatprep.subr.bf16.mxu1 %v4107_v21  ;;  %v3281_v54 = vcombine.low %v241_v50, %v4166_v38  ;;  %v5712_v21 = vshrl.u32 %v4403_v11, 16  ;;  %v1014_v50 = vshll.u32 %v4461_v57, 16  ;;  %v4167_v11 = vld [vmem:[%s4389_s19 + $0x38] ss:$0 sps:$4 sm:$0x11]   ;;  %v5141_v38 = vrot.slane %v1158_v61, 1 }
  0xb4   : > { %v1830_v26 = vsel %vm1767_vm2, %v802_v22, %v926_v1  ;;  %v1633_v22 = vor.u32 %v1632_v35, %v1628_v10  ;;  %v717_v62 = vpop.permute.xlu1 %716  ;;  %v804_v1 = vrot.slane %v4167_v11, 1  ;;  %1317 = vrot.lane.b32.xlu1 %v1286_v24, %s4291_s26  ;;  %v242_v10 = vld [vmem:[%s4389_s19 + $0x3c] sm:$0xe]  ;;  %v4168_v2 = vld [vmem:[%s4389_s19 + $0x20] ss:$0 sps:$4 sm:$0x11]  }
  0xb5   : > { %2391 = vmatprep.mubr.bf16.mxu0 %v1830_v26  ;;  %2488 = vmatmul.mubr.bf16.gmra.mrb[12].mxu1 %v1814_v14  ;;  %v1005_v40 = vor.u32 %v4843_v8, %v5712_v21  ;;  %v803_v3 = vrot.slane %v3281_v54, 1  ;;  %v1144_v8 = vshrl.u32 %v4393_v7, 16  ;;  %v1012_v14 = vshrl.u32 %v4461_v57, 16 }
  0xb6   : > { %3732 = vmatpush3.bf16.msra.mxu1 %v4109_v23  ;;  %v1778_v23 = vsel %vm1767_vm2, %v4534_v60, %v717_v62  ;;  %v1638_v20 = vsel %vm517_vm0, %v1633_v22, %v1637_v32  ;;  %v1016_v35 = vrot.slane %v1014_v50, 1  ;;  %v1019_v32 = vshll.u32 %v4168_v2, 16  ;;  %v4169_v62 = vld [vmem:[%s4389_s19 + $0x40] sm:$0xf] }
  0xb7   : > { %3733 = vmatprep.subr.bf16.mxu1 %v4112_v9  ;;  %v1156_v9 = vshrl.u32 %v4442_v43, 16  ;;  %2392 = vmatmul.mubr.bf16.gmra.mrb[12].mxu0 %v1778_v23  ;;  %v1640_v54 = vpop.permute.xlu0 %1639  ;;  %v1010_v26 = vsel %vm517_vm0, %v1005_v40, %v1009_v44  ;;  %v1096_v21 = vshrl.u32 %v4728_v31, 16  ;;  %v1100_v61 = vrot.slane %v1098_v51, 1 }
  0xb8   : > { %1669 = vrot.lane.b32.xlu0 %v1638_v20, %s4291_s26  ;;  %v1945_v60 = vsel %vm1767_vm2, %v4551_v13, %v1640_v54  ;;  %v1288_v24 = vpop.permute.xlu1 %1287  ;;  %v805_v22 = vsel %vm790_vm1, %v803_v3, %v804_v1  ;;  %v3282_v44 = vcombine.low %v242_v10, %v4169_v62  ;;  %v1026_v40 = vshll.u32 %v4498_v27, 16 }
  0xb9   : > { %2528 = vmatprep.mubr.bf16.mxu1 %v1945_v60  ;;  %v1108_v57 = vshrl.u32 %v4760_v16, 16  ;;  %v1112_v50 = vrot.slane %v1110_v59, 1  ;;  %v1168_v13 = vshrl.u32 %v4471_v5, 16  ;;  %v1170_v11 = vshll.u32 %v4471_v5, 16 }
  0xba   : > { %3734 = vmatpush3.bf16.msra.mxu1 %v4114_v42  ;;  %v1882_v42 = vsel %vm1767_vm2, %v1010_v26, %v1288_v24  ;;  %v1024_v31 = vshrl.u32 %v4498_v27, 16  ;;  %v1122_v51 = vshll.u32 %v4792_v28, 16  ;;  %v1134_v3 = vshll.u32 %v4828_v6, 16  ;;  %v4170_v59 = vld [vmem:[%s4389_s19 + $0x44] ss:$0 sps:$4 sm:$0x11]  }
  0xbb   : > { %v928_v23 = vpop.permute.xlu0 %927  ;;  %v1017_v20 = vor.u32 %v1016_v35, %v1012_v14  ;;  %v1021_v10 = vrot.slane %v1019_v32, 1  ;;  %v806_v16 = vrot.slane %v3282_v44, 1  ;;  %v807_v54 = vrot.slane %v4170_v59, 1  ;;  %v243_v44 = vld [vmem:[%s4389_s19 + $0x48] sm:$0xe] }
  0xbc   : > { %v1834_v1 = vsel %vm1767_vm2, %v805_v22, %v928_v23  ;;  %v1101_v26 = vor.u32 %v1100_v61, %v1096_v21  ;;  %v1103_v60 = vshll.u32 %v4824_v41, 16  ;;  %v1028_v27 = vrot.slane %v1026_v40, 1  ;;  %v719_v24 = vpop.permute.xlu1 %718  ;;  %v4171_v40 = vld [vmem:[%s4389_s19 + $0x2c] ss:$0 sps:$4 sm:$0x11]  }
  0xbd   : > { %2529 = vmatmul.mubr.bf16.vlgmr.msra.gmra.mrb[16].mxu1 %v1882_v42  ;;  %2399 = vmatprep.mubr.bf16.mxu0 %v1834_v1  ;;  %v1038_v2 = vshll.u32 %v4539_v0, 16  ;;  %v1113_v62 = vor.u32 %v1112_v50, %v1108_v57  ;;  %v1115_v42 = vshll.u32 %v4847_v63, 16  ;;  %v1120_v22 = vshrl.u32 %v4792_v28, 16  ;;  %v4172_v59 = vld [vmem:[%s4389_s19 + $0x4c] sm:$0xf] }
  0xbe   : > { %v1124_v14 = vrot.slane %v1122_v51, 1  ;;  %v1781_v35 = vsel %vm1767_vm2, %v4579_v47, %v719_v24  ;;  %v1105_v21 = vrot.slane %v1103_v60, 1  ;;  %v1022_v61 = vsel %vm517_vm0, %v1017_v20, %v1021_v10  ;;  %v244_v24 = vld [vmem:[%s4389_s19 + $0x54] sm:$0xe] }
  0xbf   : > { %v1642_v32 = vpop.permute.xlu0 %1641  ;;  %2400 = vmatmul.mubr.bf16.gmra.mrb[16].mxu0 %v1781_v35  ;;  %v1031_v57 = vshll.u32 %v4171_v40, 16  ;;  %v1117_v63 = vrot.slane %v1115_v42, 1  ;;  %v1132_v28 = vshrl.u32 %v4828_v6, 16  ;;  %v1136_v50 = vrot.slane %v1134_v3, 1 }
  0xc0   : > { %v1948_v41 = vsel %vm1767_vm2, %v4584_v55, %v1642_v32  ;;  %v808_v47 = vsel %vm790_vm1, %v806_v16, %v807_v54  ;;  %v5176_v51 = vsel %vm517_vm0, %v1101_v26, %v1105_v21  ;;  %v5178_v23 = vrot.slane %v1170_v11, 1  ;;  %v1290_v55 = vpop.permute.xlu1 %1289 }
  0xc1   : > { %2536 = vmatprep.mubr.bf16.mxu1 %v1948_v41  ;;  %v1036_v1 = vshrl.u32 %v4539_v0, 16  ;;  %v3283_v20 = vcombine.low %v243_v44, %v4172_v59  ;;  %v5183_v10 = vsel %vm517_vm0, %v1113_v62, %v1117_v63  ;;  %v1040_v60 = vrot.slane %v1038_v2, 1  ;;  %v4173_v2 = vld [vmem:[%s4389_s19 + $0x50] ss:$0 sps:$4 sm:$0x11]  }
  0xc2   : > { %v1886_v3 = vsel %vm1767_vm2, %v1022_v61, %v1290_v55  ;;  %v1125_v16 = vor.u32 %v1124_v14, %v1120_v22  ;;  %v1127_v54 = vshll.u32 %v4873_v34, 16  ;;  %v1050_v11 = vshll.u32 %v4589_v58, 16  ;;  %v4174_v22 = vld [vmem:[%s4389_s19 + $0x58] sm:$0xf] }
  0xc3   : > { %v930_v6 = vpop.permute.xlu0 %929  ;;  %v1029_v26 = vor.u32 %v1028_v27, %v1024_v31  ;;  %v1033_v42 = vrot.slane %v1031_v57, 1  ;;  %v1180_v62 = vshrl.u32 %v4523_v48, 16  ;;  %v810_v35 = vrot.slane %v4173_v2, 1  ;;  %v4175_v14 = vld [vmem:[%s4389_s19 + $0x38] ss:$0 sps:$4 sm:$0x11]  }
  0xc4   : > { %v1838_v0 = vsel %vm1767_vm2, %v808_v47, %v930_v6  ;;  %v1129_v32 = vrot.slane %v1127_v54, 1  ;;  %v1137_v44 = vor.u32 %v1136_v50, %v1132_v28  ;;  %v721_v21 = vpop.permute.xlu1 %720  ;;  %v809_v41 = vrot.slane %v3283_v20, 1  ;;  %v4176_v20 = vld [vmem:[%s4389_s19 + $0x5c] ss:$0 sps:$4 sm:$0x11]  }
  0xc5   : > { %2537 = vmatmul.mubr.bf16.gmra.mrb[20].mxu1 %v1886_v3  ;;  %2407 = vmatprep.mubr.bf16.mxu0 %v1838_v0  ;;  %v3284_v34 = vcombine.low %v244_v24, %v4174_v22  ;;  %v1043_v61 = vshll.u32 %v4175_v14, 16  ;;  %v1139_v40 = vshll.u32 %v4905_v15, 16  ;;  %v1182_v63 = vshll.u32 %v4523_v48, 16 }
  0xc6   : > { %v1048_v31 = vshrl.u32 %v4589_v58, 16  ;;  %v1784_v27 = vsel %vm1767_vm2, %v4612_v25, %v721_v21  ;;  %v5200_v57 = vsel %vm517_vm0, %v1125_v16, %v1129_v32  ;;  %v1052_v28 = vrot.slane %v1050_v11, 1  ;;  %v3241_v32 = vld [vmem:[%s4389_s19 + $0xa8] sm:$0xe]  ;;  %v4178_v21 = vld [vmem:[%s4389_s19 + $0x64] sm:$0xf] }
  0xc7   : > { %2408 = vmatmul.mubr.bf16.gmra.mrb[20].mxu0 %v1784_v27  ;;  %v1644_v50 = vpop.permute.xlu0 %1643  ;;  %v1034_v47 = vsel %vm517_vm0, %v1029_v26, %v1033_v42  ;;  %v1041_v55 = vor.u32 %v1040_v60, %v1036_v1  ;;  %v1141_v59 = vrot.slane %v1139_v40, 1  ;;  %v813_v58 = vrot.slane %v4176_v20, 1  ;;  %v5212_v60 = vld [vmem:[%s4389_s19 + $0x60] sm:$0xe] }
  0xc8   : > { %v1951_v15 = vsel %vm1767_vm2, %v4629_v39, %v1644_v50  ;;  %v1149_v25 = vor.u32 %v5138_v18, %v1144_v8  ;;  %v1151_v6 = vshll.u32 %v4947_v52, 16  ;;  %v1292_v3 = vpop.permute.xlu1 %1291  ;;  %v811_v24 = vsel %vm790_vm1, %v809_v41, %v810_v35  ;;  %v3240_v18 = vld [vmem:[%s4389_s19 + $0x9c] sm:$0xe]  ;;  %v4177_v26 = vld [vmem:[%s4389_s19 + $0x44] ss:$0 sps:$4 sm:$0x11]  }
  0xc9   : > { %2544 = vmatprep.mubr.bf16.mxu1 %v1951_v15  ;;  %v812_v16 = vrot.slane %v3284_v34, 1  ;;  %v1045_v1 = vrot.slane %v1043_v61, 1  ;;  %v5215_v39 = vsel %vm517_vm0, %v1137_v44, %v1141_v59  ;;  %v1184_v54 = vrot.slane %v1182_v63, 1  ;;  %v3242_v61 = vld [vmem:[%s4389_s19 + $0xb4] sm:$0xe] }
  0xca   : > { %v1062_v7 = vshll.u32 %v4627_v37, 16  ;;  %v1890_v8 = vsel %vm1767_vm2, %v1034_v47, %v1292_v3  ;;  %v1153_v52 = vrot.slane %v1151_v6, 1  ;;  %v5220_v0 = vor.u32 %v1052_v28, %v1048_v31  ;;  %v5714_v47 = vld [vmem:[#allocation5_spill] sm:$0xff]  ;;  %v3243_v15 = vld [vmem:[%s4389_s19 + $0xc0] sm:$0xe] }
  0xcb   : > { %v932_v11 = vpop.permute.xlu0 %931  ;;  %v1055_v42 = vshll.u32 %v4177_v26, 16  ;;  %v1161_v2 = vor.u32 %v5141_v38, %v1156_v9  ;;  %v1163_v35 = vshll.u32 %v5011_v46, 16  ;;  %v3285_v41 = vcombine.low %v5212_v60, %v4178_v21 }
  0xcc   : > { %v1842_v44 = vsel %vm1767_vm2, %v811_v24, %v932_v11  ;;  %v5232_v22 = vsel %vm517_vm0, %v1149_v25, %v1153_v52  ;;  %v1173_v34 = vor.u32 %v5178_v23, %v1168_v13  ;;  %v723_v14 = vpop.permute.xlu1 %722  ;;  %v814_v43 = vsel %vm790_vm1, %v812_v16, %v813_v58  ;;  %v5715_v58 = vld [vmem:[#allocation24_spill] sm:$0xff] }
  0xcd   : > { %2545 = vmatmul.mubr.bf16.gmra.mrb[24].mxu1 %v1890_v8  ;;  %2415 = vmatprep.mubr.bf16.mxu0 %v1842_v44  ;;  %v1046_v9 = vsel %vm517_vm0, %v1041_v55, %v1045_v1  ;;  %v1165_v46 = vrot.slane %v1163_v35, 1  ;;  %v3384_v38 = vcombine.low %v3240_v18, %v4885_v36  ;;  %v1787_v40 = vsel %vm1767_vm2, %v4641_v4, %v723_v14  ;;  %v5713_v36 = vld [vmem:[#allocation22_spill] sm:$0xff]  ;;  %v5716_v44 = vld [vmem:[#allocation7_spill] sm:$0xff]  ;;  %v4180_v14 = vld [vmem:[%s4389_s19 + $0x50] ss:$0 sps:$4 sm:$0x11]  }
  0xce   : > { %v1753_v63 = vrot.slane %v4893_v45, 1  ;;  %v1175_v5 = vshll.u32 %v5079_v17, 16  ;;  %v3385_v13 = vcombine.low %v3241_v32, %v4923_v30  ;;  %v1057_v31 = vrot.slane %v1055_v42, 1  ;;  %v3244_v17 = vld [vmem:[%s4389_s19 + $0xcc] sm:$0xe] }
  0xcf   : > { %2416 = vmatmul.mubr.bf16.gmra.mrb[24].mxu0 %v1787_v40  ;;  %v1646_v23 = vpop.permute.xlu0 %1645  ;;  %v5247_v27 = vsel %vm517_vm0, %v1161_v2, %v1165_v46  ;;  %v1752_v28 = vrot.slane %v3384_v38, 1  ;;  %v1756_v50 = vrot.slane %v5713_v36, 1  ;;  %v3386_v45 = vcombine.low %v3242_v61, %v4974_v49  ;;  %v5717_v38 = vld [vmem:[#allocation8_spill] sm:$0xff]  ;;  %v4181_v40 = vld [vmem:[%s4389_s19 + $0x70] sm:$0xf] }
  0xd0   : > { %v1954_v55 = vsel %vm1767_vm2, %v5714_v47, %v1646_v23  ;;  %v1177_v59 = vrot.slane %v1175_v5, 1  ;;  %v1755_v4 = vrot.slane %v3385_v13, 1  ;;  %v1294_v20 = vpop.permute.xlu1 %1293  ;;  %v1759_v25 = vrot.slane %v5715_v58, 1  ;;  %v5718_v5 = vld [vmem:[#allocation6_spill] sm:$0xff] }
  0xd1   : > { %2552 = vmatprep.mubr.bf16.mxu1 %v1954_v55  ;;  %v5256_v30 = vsel %vm790_vm1, %v1752_v28, %v1753_v63  ;;  %v1185_v6 = vor.u32 %v1184_v54, %v1180_v62  ;;  %v1187_v3 = vshll.u32 %v5098_v29, 16  ;;  %v1894_v24 = vsel %vm1767_vm2, %v1046_v9, %v1294_v20  ;;  %v4179_v62 = vld [vmem:[%s4389_s19 + $0x68] ss:$0 sps:$4 sm:$0x11]  }
  0xd2   : > { %v5264_v16 = vsel %vm517_vm0, %v1173_v34, %v1177_v59  ;;  %v5267_v49 = vsel %vm790_vm1, %v1755_v4, %v1756_v50  ;;  %v1758_v1 = vrot.slane %v3386_v45, 1  ;;  %v3387_v52 = vcombine.low %v3243_v15, %v5043_v19  ;;  %v246_v34 = vld [vmem:[%s4389_s19 + $0x6c] sm:$0xe]  ;;  %v4182_v55 = vld [vmem:[%s4389_s19 + $0x74] ss:$0 sps:$4 sm:$0x11]  }
  0xd3   : > { %v934_v60 = vpop.permute.xlu0 %933  ;;  %v1189_v8 = vrot.slane %v1187_v3, 1  ;;  %v1762_v18 = vrot.slane %v5054_v53, 1  ;;  %v3388_v48 = vcombine.low %v3244_v17, %v5083_v56  ;;  %v816_v54 = vrot.slane %v4179_v62, 1  ;;  %v5719_v4 = vld [vmem:[#allocation10_spill] sm:$0xff] }
  0xd4   : > { %v1846_v29 = vsel %vm1767_vm2, %v814_v43, %v934_v60  ;;  %v5275_v11 = vsel %vm790_vm1, %v1758_v1, %v1759_v25  ;;  %v1765_v26 = vrot.slane %v5091_v33, 1  ;;  %v725_v42 = vpop.permute.xlu1 %724  ;;  %v815_v2 = vrot.slane %v3285_v41, 1  ;;  %v247_v15 = vld [vmem:[%s4389_s19 + $0x78] sm:$0xe] }
  0xd5   : > { %2553 = vmatmul.mubr.bf16.gmra.mrb[28].mxu1 %v1894_v24  ;;  %2423 = vmatprep.mubr.bf16.mxu0 %v1846_v29  ;;  %v5279_v19 = vsel %vm517_vm0, %v1185_v6, %v1189_v8  ;;  %v1761_v53 = vrot.slane %v3387_v52, 1  ;;  %v1764_v35 = vrot.slane %v3388_v48, 1  ;;  %v1060_v56 = vshrl.u32 %v4627_v37, 16  ;;  %v4183_v6 = vld [vmem:[%s4389_s19 + $0x5c] ss:$0 sps:$4 sm:$0x11]  }
  0xd6   : > { %v1064_v32 = vrot.slane %v1062_v7, 1  ;;  %v1790_v21 = vsel %vm1767_vm2, %v5716_v44, %v725_v42  ;;  %v1058_v41 = vsel %vm517_vm0, %v5220_v0, %v1057_v31  ;;  %v1067_v43 = vshll.u32 %v4180_v14, 16  ;;  %v5720_v24 = vld [vmem:[#allocation11_spill] sm:$0xff]  ;;  %v4184_v52 = vld [vmem:[%s4389_s19 + $0x7c] sm:$0xf]  ;;  %v5721_v29 = vld [vmem:[#allocation9_spill] sm:$0xff] }
  0xd7   : > { %2424 = vmatmul.mubr.bf16.gmra.mrb[28].mxu0 %v1790_v21  ;;  %v1648_v33 = vpop.permute.xlu0 %1647  ;;  %v5291_v9 = vsel %vm790_vm1, %v1761_v53, %v1762_v18  ;;  %v5294_v46 = vsel %vm790_vm1, %v1764_v35, %v1765_v26  ;;  %v817_v61 = vsel %vm790_vm1, %v815_v2, %v816_v54  ;;  %v3286_v63 = vcombine.low %v246_v34, %v4181_v40  ;;  %v5722_v44 = vld [vmem:[#allocation12_spill] sm:$0xff]  ;;  %v248_v34 = vld [vmem:[%s4389_s19 + $0x84] sm:$0xe] }
  0xd8   : > { %v1957_v37 = vsel %vm1767_vm2, %v5717_v38, %v1648_v33  ;;  %v1296_v7 = vpop.permute.xlu1 %1295  ;;  %v1074_v13 = vshll.u32 %v5718_v5, 16  ;;  %v1065_v31 = vor.u32 %v1064_v32, %v1060_v56  ;;  %v1069_v28 = vrot.slane %v1067_v43, 1  ;;  %v4185_v56 = vld [vmem:[%s4389_s19 + $0x80] ss:$0 sps:$4 sm:$0x11]  }
  0xd9   : > { %2560 = vmatprep.mubr.bf16.mxu1 %v1957_v37  ;;  %v1898_v0 = vsel %vm1767_vm2, %v1058_v41, %v1296_v7  ;;  %v818_v47 = vrot.slane %v3286_v63, 1  ;;  %v819_v59 = vrot.slane %v4182_v55, 1  ;;  %v1072_v17 = vshrl.u32 %v5718_v5, 16  ;;  %v4186_v38 = vld [vmem:[%s4389_s19 + $0x68] ss:$0 sps:$4 sm:$0x11]  }
  0xda   : > { %v1076_v20 = vrot.slane %v1074_v13, 1  ;;  %v1070_v25 = vsel %vm517_vm0, %v1065_v31, %v1069_v28  ;;  %v1079_v3 = vshll.u32 %v4183_v6, 16  ;;  %v3287_v18 = vcombine.low %v247_v15, %v4184_v52  ;;  %v5723_v7 = vld [vmem:[#allocation13_spill] sm:$0xff]  ;;  %v5725_v6 = vld [vmem:[#allocation15_spill] sm:$0xff] }
  0xdb   : > { %v936_v23 = vpop.permute.xlu0 %935  ;;  %v820_v8 = vsel %vm790_vm1, %v818_v47, %v819_v59  ;;  %v1086_v62 = vshll.u32 %v5721_v29, 16  ;;  %v822_v32 = vrot.slane %v4185_v56, 1  ;;  %v1084_v33 = vshrl.u32 %v5721_v29, 16  ;;  %v4188_v59 = vld [vmem:[%s4389_s19 + $0x8c] ss:$0 sps:$4 sm:$0x11]  }
  0xdc   : > { %v1850_v36 = vsel %vm1767_vm2, %v817_v61, %v936_v23  ;;  %v727_v50 = vpop.permute.xlu1 %726  ;;  %v1077_v26 = vor.u32 %v1076_v20, %v1072_v17  ;;  %v1081_v42 = vrot.slane %v1079_v3, 1  ;;  %v821_v35 = vrot.slane %v3287_v18, 1  ;;  %v3229_v23 = vld [vmem:[%s4389_s19 + $0x18] sm:$0xe]  ;;  %v3230_v18 = vld [vmem:[%s4389_s19 + $0x24] sm:$0xe] }
  0xdd   : > { %2561 = vmatmul.mubr.bf16.gmra.mrb[32].mxu1 %v1898_v0  ;;  %2431 = vmatprep.mubr.bf16.mxu0 %v1850_v36  ;;  %v1793_v45 = vsel %vm1767_vm2, %v5719_v4, %v727_v50  ;;  %v1088_v41 = vrot.slane %v1086_v62, 1  ;;  %v1091_v37 = vshll.u32 %v4186_v38, 16  ;;  %v4187_v0 = vld [vmem:[%s4389_s19 + $0x88] sm:$0xf]  ;;  %v825_v4 = vrot.slane %v4188_v59, 1  ;;  %v5724_v17 = vld [vmem:[#allocation14_spill] sm:$0xff] }
  0xde   : > { %v1082_v43 = vsel %vm517_vm0, %v1077_v26, %v1081_v42  ;;  %v823_v63 = vsel %vm790_vm1, %v821_v35, %v822_v32  ;;  %v3288_v5 = vcombine.low %v248_v34, %v4187_v0  ;;  %v3231_v29 = vld [vmem:[%s4389_s19 + $0x30] sm:$0xe]  ;;  %v4191_v26 = vld [vmem:[%s4389_s19 + $0x28] sm:$0xf]  ;;  %v4192_v35 = vld [vmem:[%s4389_s19 + $0x34] sm:$0xf] }
  0xdf   : > { %2432 = vmatmul.mubr.bf16.gmra.mrb[32].mxu0 %v1793_v45  ;;  %v1650_v58 = vpop.permute.xlu0 %1649  ;;  %v1089_v28 = vor.u32 %v1088_v41, %v1084_v33  ;;  %v1093_v36 = vrot.slane %v1091_v37, 1  ;;  %v4189_v45 = vld [vmem:[%s4389_s19 + $0x1c] sm:$0xf]  ;;  %v3374_v42 = vcombine.low %v3230_v18, %v4191_v26  ;;  %v3375_v56 = vcombine.low %v3231_v29, %v4192_v35  ;;  %v5726_v32 = vld [vmem:[#allocation16_spill] sm:$0xff]  ;;  %v5727_v41 = vld [vmem:[#allocation17_spill] sm:$0xff] }
  0xe0   : > { %v1960_v1 = vsel %vm1767_vm2, %v5720_v24, %v1650_v58  ;;  %v1298_v60 = vpop.permute.xlu1 %1297  ;;  %v824_v55 = vrot.slane %v3288_v5, 1  ;;  %v3373_v15 = vcombine.low %v3229_v23, %v4189_v45  ;;  %v4193_v34 = vld [vmem:[%s4389_s19 + $0x2c] ss:$0 sps:$4 sm:$0x11]   ;;  %v3233_v0 = vld [vmem:[%s4389_s19 + $0x48] sm:$0xe] }
  0xe1   : > { %2568 = vmatprep.mubr.bf16.mxu1 %v1960_v1  ;;  %v1902_v48 = vsel %vm1767_vm2, %v1070_v25, %v1298_v60  ;;  %v1094_v25 = vsel %vm517_vm0, %v1089_v28, %v1093_v36  ;;  %v1723_v33 = vrot.slane %v4193_v34, 1  ;;  %v1725_v37 = vrot.slane %v3375_v56, 1  ;;  %v4195_v23 = vld [vmem:[%s4389_s19 + $0x40] sm:$0xf]  ;;  %v5728_v36 = vld [vmem:[#allocation18_spill] sm:$0xff] }
  0xe2   : > { %v826_v1 = vsel %vm790_vm1, %v824_v55, %v825_v4  ;;  %v1719_v60 = vrot.slane %v3373_v15, 1  ;;  %v4196_v55 = vld [vmem:[%s4389_s19 + $0x4c] sm:$0xf]  ;;  %v4197_v45 = vld [vmem:[%s4389_s19 + $0x44] ss:$0 sps:$4 sm:$0x11]  }
  0xe3   : > { %v938_v54 = vpop.permute.xlu0 %937  ;;  %v3377_v59 = vcombine.low %v3233_v0, %v4196_v55  ;;  %v1729_v15 = vrot.slane %v4197_v45, 1  ;;  %v4201_v26 = vld [vmem:[%s4389_s19 + $0x5c] ss:$0 sps:$4 sm:$0x11]   ;;  %v3236_v56 = vld [vmem:[%s4389_s19 + $0x6c] sm:$0xe] }
  0xe4   : > { %v1854_v2 = vsel %vm1767_vm2, %v820_v8, %v938_v54  ;;  %v729_v53 = vpop.permute.xlu1 %728  ;;  %v4190_v8 = vld [vmem:[%s4389_s19 + $0x20] ss:$0 sps:$4 sm:$0x11]  }
  0xe5   : > { %2569 = vmatmul.mubr.bf16.gmra.mrb[36].mxu1 %v1902_v48  ;;  %2439 = vmatprep.mubr.bf16.mxu0 %v1854_v2  ;;  %v1796_v21 = vsel %vm1767_vm2, %v5722_v44, %v729_v53  ;;  %v1720_v52 = vrot.slane %v4190_v8, 1 }
  0xe7   : > { %2440 = vmatmul.mubr.bf16.gmra.mrb[36].mxu0 %v1796_v21  ;;  %v1652_v14 = vpop.permute.xlu0 %1651  ;;  %v1721_v53 = vsel %vm790_vm1, %v1719_v60, %v1720_v52  ;;  %v4199_v60 = vld [vmem:[%s4389_s19 + $0x58] sm:$0xf] }
  0xe8   : > { %v1963_v61 = vsel %vm1767_vm2, %v5723_v7, %v1652_v14  ;;  %v1300_v40 = vpop.permute.xlu1 %1299  ;;  %v4194_v7 = vld [vmem:[%s4389_s19 + $0x38] ss:$0 sps:$4 sm:$0x11]  }
  0xe9   : > { %2576 = vmatprep.mubr.bf16.mxu1 %v1963_v61  ;;  %v1906_v13 = vsel %vm1767_vm2, %v1082_v43, %v1300_v40  ;;  %v1722_v43 = vrot.slane %v3374_v42, 1  ;;  %v1726_v61 = vrot.slane %v4194_v7, 1  ;;  %v3232_v40 = vld [vmem:[%s4389_s19 + $0x3c] sm:$0xe]  ;;  %v1735_v42 = vrot.slane %v4201_v26, 1 }
  0xeb   : > { %v940_v31 = vpop.permute.xlu0 %939  ;;  %v1724_v5 = vsel %vm790_vm1, %v1722_v43, %v1723_v33  ;;  %v4203_v33 = vld [vmem:[%s4389_s19 + $0x70] sm:$0xf] }
  0xec   : > { %v1858_v50 = vsel %vm1767_vm2, %v823_v63, %v940_v31  ;;  %v731_v47 = vpop.permute.xlu1 %730  ;;  %v3376_v31 = vcombine.low %v3232_v40, %v4195_v23  ;;  %v4205_v40 = vld [vmem:[%s4389_s19 + $0x74] ss:$0 sps:$4 sm:$0x11]   ;;  %v3238_v23 = vld [vmem:[%s4389_s19 + $0x84] sm:$0xe] }
  0xed   : > { %2577 = vmatmul.mubr.bf16.gmra.mrb[40].mxu1 %v1906_v13  ;;  %2447 = vmatprep.mubr.bf16.mxu0 %v1858_v50  ;;  %v1799_v20 = vsel %vm1767_vm2, %v5724_v17, %v731_v47  ;;  %v1727_v47 = vsel %vm790_vm1, %v1725_v37, %v1726_v61  ;;  %v1731_v17 = vrot.slane %v3377_v59, 1 }
  0xee   : > { %v1728_v4 = vrot.slane %v3376_v31, 1 }
  0xef   : > { %2448 = vmatmul.mubr.bf16.gmra.mrb[40].mxu0 %v1799_v20  ;;  %v1654_v58 = vpop.permute.xlu0 %1653  ;;  %v4198_v20 = vld [vmem:[%s4389_s19 + $0x50] ss:$0 sps:$4 sm:$0x11]  }
  0xf0   : > { %v1966_v3 = vsel %vm1767_vm2, %v5725_v6, %v1654_v58  ;;  %v1302_v24 = vpop.permute.xlu1 %1301  ;;  %v1732_v58 = vrot.slane %v4198_v20, 1  ;;  %v4209_v20 = vld [vmem:[%s4389_s19 + $0x8c] ss:$0 sps:$4 sm:$0x11]  }
  0xf1   : > { %2584 = vmatprep.mubr.bf16.mxu1 %v1966_v3  ;;  %v1910_v48 = vsel %vm1767_vm2, %v1094_v25, %v1302_v24  ;;  %v3234_v25 = vld [vmem:[%s4389_s19 + $0x54] sm:$0xe]  ;;  %v3235_v3 = vld [vmem:[%s4389_s19 + $0x60] sm:$0xe] }
  0xf2   : > { %v5729_v24 = vld [vmem:[#allocation19_spill] sm:$0xff]  ;;  %v3378_v8 = vcombine.low %v3234_v25, %v4199_v60  ;;  %v1733_v18 = vsel %vm790_vm1, %v1731_v17, %v1732_v58  ;;  %v1747_v58 = vrot.slane %v4209_v20, 1 }
  0xf3   : > { %v942_v62 = vpop.permute.xlu0 %941 }
  0xf4   : > { %v1862_v54 = vsel %vm1767_vm2, %v826_v1, %v942_v62  ;;  %v733_v2 = vpop.permute.xlu1 %732 }
  0xf5   : > { %2585 = vmatmul.mubr.bf16.gmra.mrb[44].mxu1 %v1910_v48  ;;  %2455 = vmatprep.mubr.bf16.mxu0 %v1862_v54  ;;  %v1802_v44 = vsel %vm1767_vm2, %v5726_v32, %v733_v2  ;;  %v4200_v48 = vld [vmem:[%s4389_s19 + $0x64] sm:$0xf]  ;;  %v1734_v54 = vrot.slane %v3378_v8, 1 }
  0xf6   : > { %v3379_v29 = vcombine.low %v3235_v3, %v4200_v48  ;;  %v4210_v3 = vld [vmem:[%s4389_s19 + $0x98] ss:$0 sps:$4 sm:$0x11]  }
  0xf7   : > { %2456 = vmatmul.mubr.bf16.gmra.mrb[44].mxu0 %v1802_v44  ;;  %v1656_v21 = vpop.permute.xlu0 %1655  ;;  %v3237_v44 = vld [vmem:[%s4389_s19 + $0x78] sm:$0xe] }
  0xf8   : > { %v1969_v14 = vsel %vm1767_vm2, %v5727_v41, %v1656_v21  ;;  %3859 = vmatprep.mubr.msk.bf16.mxu0 %vm1767_vm2, %v1721_v53  ;;  %v1304_v38 = vpop.permute.xlu1 %1303  ;;  %v1737_v2 = vrot.slane %v3379_v29, 1  ;;  %v4202_v53 = vld [vmem:[%s4389_s19 + $0x68] ss:$0 sps:$4 sm:$0x11]   ;;  %v3380_v41 = vcombine.low %v3236_v56, %v4203_v33 }
  0xf9   : > { %2592 = vmatprep.mubr.bf16.mxu1 %v1969_v14  ;;  %v1914_v63 = vsel %vm1767_vm2, %v5176_v51, %v1304_v38  ;;  %v1738_v35 = vrot.slane %v4202_v53, 1  ;;  %v5730_v21 = vld [vmem:[#allocation20_spill] sm:$0xff]  ;;  %v4204_v38 = vld [vmem:[%s4389_s19 + $0x7c] sm:$0xf] }
  0xfa   : > { %v3381_v37 = vcombine.low %v3237_v44, %v4204_v38  ;;  %v1740_v61 = vrot.slane %v3380_v41, 1 }
  0xfb   : > { %v1658_v13 = vpop.permute.xlu0 %1657  ;;  %v1739_v43 = vsel %vm790_vm1, %v1737_v2, %v1738_v35 }
  0xfc   : > { %v1306_v28 = vpop.permute.xlu1 %1305  ;;  %v1972_v50 = vsel %vm1767_vm2, %v5728_v36, %v1658_v13  ;;  %v1743_v0 = vrot.slane %v3381_v37, 1  ;;  %v5731_v36 = vld [vmem:[#allocation21_spill] sm:$0xff] }
  0xfd   : > { %2593 = vmatmul.mubr.bf16.gmra.mrb[48].mxu1 %v1914_v63  ;;  %v1918_v51 = vsel %vm1767_vm2, %v5183_v10, %v1306_v28  ;;  %v1730_v10 = vsel %vm790_vm1, %v1728_v4, %v1729_v15  ;;  %v1741_v63 = vrot.slane %v4205_v40, 1  ;;  %v3239_v28 = vld [vmem:[%s4389_s19 + $0x90] sm:$0xe]  ;;  %v4208_v4 = vld [vmem:[%s4389_s19 + $0x94] sm:$0xf] }
  0xfe   : > { %2600 = vmatprep.mubr.bf16.mxu1 %v1972_v50  ;;  %v3383_v45 = vcombine.low %v3239_v28, %v4208_v4 }
  0xff   : > { %3860 = vmatmul.mubr.msk.bf16.vlgmr.msra.gmra.mrb[48].mxu0 %vm1767_vm2, %v1724_v5  ;;  %v1660_v6 = vpop.permute.xlu0 %1659  ;;  %v4206_v5 = vld [vmem:[%s4389_s19 + $0x80] ss:$0 sps:$4 sm:$0x11]  }
 0x100   : > { %3863 = vmatprep.mubr.msk.bf16.mxu0 %vm1767_vm2, %v1727_v47  ;;  %v1975_v1 = vsel %vm1767_vm2, %v5729_v24, %v1660_v6  ;;  %v1308_v52 = vpop.permute.xlu1 %1307  ;;  %v1744_v13 = vrot.slane %v4206_v5, 1  ;;  %v1742_v47 = vsel %vm790_vm1, %v1740_v61, %v1741_v63  ;;  %v1749_v6 = vrot.slane %v3383_v45, 1 }
 0x101   : > { %v1922_v62 = vsel %vm1767_vm2, %v5200_v57, %v1308_v52  ;;  %v1736_v57 = vsel %vm790_vm1, %v1734_v54, %v1735_v42  ;;  %v1750_v24 = vrot.slane %v4210_v3, 1 }
 0x103   : > { %v1751_v52 = vsel %vm790_vm1, %v1749_v6, %v1750_v24 }
 0x105   : > { %2601 = vmatmul.mubr.bf16.gmra.mrb[52].mxu1 %v1918_v51  ;;  %v1745_v51 = vsel %vm790_vm1, %v1743_v0, %v1744_v13 }
 0x106   : > { %2608 = vmatprep.mubr.bf16.mxu1 %v1975_v1  ;;  %v1310_v14 = vpop.permute.xlu1 %1309  ;;  %v5732_v1 = vld [vmem:[#allocation23_spill] sm:$0xff] }
 0x107   : > { %3864 = vmatmul.mubr.msk.bf16.gmra.mrb[52].mxu0 %vm1767_vm2, %v1730_v10  ;;  %v1926_v7 = vsel %vm1767_vm2, %v5215_v39, %v1310_v14  ;;  %v4207_v39 = vld [vmem:[%s4389_s19 + $0x88] sm:$0xf] }
 0x108   : > { %3867 = vmatprep.mubr.msk.bf16.mxu0 %vm1767_vm2, %v1733_v18  ;;  %v1662_v32 = vpop.permute.xlu0 %1661  ;;  %v3382_v55 = vcombine.low %v3238_v23, %v4207_v39 }
 0x109   : > { %v1978_v34 = vsel %vm1767_vm2, %v5730_v21, %v1662_v32 }
 0x10a   : > { %v1746_v17 = vrot.slane %v3382_v55, 1 }
 0x10c   : > { %v1748_v60 = vsel %vm790_vm1, %v1746_v17, %v1747_v58 }
 0x10d   : > { %2609 = vmatmul.mubr.bf16.gmra.mrb[56].mxu1 %v1922_v62 }
 0x10e   : > { %2616 = vmatprep.mubr.bf16.mxu1 %v1978_v34 }
 0x10f   : > { %3868 = vmatmul.mubr.msk.bf16.gmra.mrb[56].mxu0 %vm1767_vm2, %v1736_v57 }
 0x110   : > { %3871 = vmatprep.mubr.msk.bf16.mxu0 %vm1767_vm2, %v1739_v43 }
 0x112   : > { %v1312_v59 = vpop.permute.xlu1 %1311 }
 0x113   : > { %v1664_v31 = vpop.permute.xlu0 %1663  ;;  %v1930_v15 = vsel %vm1767_vm2, %v5232_v22, %v1312_v59 }
 0x114   : > { %v1981_v50 = vsel %vm1767_vm2, %v5731_v36, %v1664_v31 }
 0x115   : > { %2617 = vmatmul.mubr.bf16.gmra.mrb[60].mxu1 %v1926_v7 }
 0x116   : > { %2624 = vmatprep.mubr.bf16.mxu1 %v1981_v50 }
 0x117   : > { %3872 = vmatmul.mubr.msk.bf16.gmra.mrb[60].mxu0 %vm1767_vm2, %v1742_v47 }
 0x118   : > { %3875 = vmatprep.mubr.msk.bf16.mxu0 %vm1767_vm2, %v1745_v51 }
 0x11a   : > { %v1666_v25 = vpop.permute.xlu0 %1665  ;;  %v1314_v8 = vpop.permute.xlu1 %1313 }
 0x11b   : > { %v1984_v10 = vsel %vm1767_vm2, %v5732_v1, %v1666_v25  ;;  %v1934_v22 = vsel %vm1767_vm2, %v5247_v27, %v1314_v8  ;;  %v5733_v27 = vld [vmem:[#allocation25_spill] sm:$0xff]  ;;  %v5457_v1 = vld [vmem:[%s5662_s2] ss:$0 sm:$0xff] }
 0x11d   : > { %2625 = vmatmul.mubr.bf16.gmra.mrb[64].mxu1 %v1930_v15 }
 0x11e   : > { %2632 = vmatprep.mubr.bf16.mxu1 %v1984_v10 }
 0x11f   : > { %3876 = vmatmul.mubr.msk.bf16.gmra.mrb[64].mxu0 %vm1767_vm2, %v1748_v60 }
 0x120   : > { %3879 = vmatprep.mubr.msk.bf16.mxu0 %vm1767_vm2, %v1751_v52 }
 0x122   : > { %v1668_v18 = vpop.permute.xlu0 %1667  ;;  %v1316_v29 = vpop.permute.xlu1 %1315 }
 0x123   : > { %v1987_v48 = vsel %vm1767_vm2, %v5051_v12, %v1668_v18  ;;  %v1938_v62 = vsel %vm1767_vm2, %v5264_v16, %v1316_v29 }
 0x125   : > { %2633 = vmatmul.mubr.bf16.gmra.mrb[68].mxu1 %v1934_v22 }
 0x126   : > { %2640 = vmatprep.mubr.bf16.mxu1 %v1987_v48  ;;  %v1318_v42 = vpop.permute.xlu1 %1317 }
 0x127   : > { %3880 = vmatmul.mubr.msk.bf16.gmra.mrb[68].mxu0 %vm1767_vm2, %v5256_v30  ;;  %v1942_v12 = vsel %vm1767_vm2, %v5279_v19, %v1318_v42 }
 0x128   : > { %3883 = vmatprep.mubr.msk.bf16.mxu0 %vm1767_vm2, %v5267_v49 }
 0x12a   : > { %v1670_v54 = vpop.permute.xlu0 %1669 }
 0x12b   : > { %v1990_v26 = vsel %vm1767_vm2, %v5733_v27, %v1670_v54 }
 0x12d   : > { %2641 = vmatmul.mubr.bf16.gmra.mrb[72].mxu1 %v1938_v62 }
 0x12e   : > { %2648 = vmatprep.mubr.bf16.mxu1 %v1990_v26 }
 0x12f   : > { %3884 = vmatmul.mubr.msk.bf16.gmra.mrb[72].mxu0 %vm1767_vm2, %v5275_v11 }
 0x130   : > { %3887 = vmatprep.mubr.msk.bf16.mxu0 %vm1767_vm2, %v5291_v9 }
 0x135   : > { %2649 = vmatmul.mubr.bf16.gmra.mrb[76].mxu1 %v1942_v12 }
 0x137   : > { %3888 = vmatmul.mubr.msk.bf16.gmra.mrb[76].mxu0 %vm1767_vm2, %v5294_v46 }
 0x170   : > { %v3695_v30 = vpop.f32.mrb[0].mxu1 }
 0x171   : > { %v3696_v16 = vpop.f32.mrb[1].mxu1  ;;  %v3623_v53 = vpop.f32.mrb[0].mxu0 }
 0x172   : > { %v5438_v49 = vadd.f32 %v3696_v16, %v3695_v30  ;;  %v3698_v2 = vpop.f32.mrb[2].mxu1  ;;  %v3624_v56 = vpop.f32.mrb[1].mxu0 }
 0x173   : > { %v3699_v35 = vpop.f32.mrb[3].mxu1  ;;  %v3625_v11 = vadd.f32 %v3624_v56, %v3623_v53  ;;  %v3626_v44 = vpop.f32.mrb[2].mxu0 }
 0x174   : > { %v5440_v32 = vadd.f32 %v3699_v35, %v3698_v2  ;;  %v3627_v19 = vpop.f32.mrb[3].mxu0 }
 0x175   : > { %v3628_v21 = vadd.f32 %v3627_v19, %v3626_v44  ;;  %v2370_v60 = vadd.f32 %v3625_v11, %v5457_v1 }
 0x177   : > { %v2373_v18 = vadd.f32 %v3628_v21, %v5457_v1 }
 0x178   : > { %v3701_v34 = vpop.f32.mrb[4].mxu1 }
 0x179   : > { %v3702_v9 = vpop.f32.mrb[5].mxu1 }
 0x17a   : > { %v5442_v57 = vadd.f32 %v3702_v9, %v3701_v34  ;;  %v3704_v33 = vpop.f32.mrb[6].mxu1  ;;  %v3629_v41 = vpop.f32.mrb[4].mxu0 }
 0x17b   : > { %v3705_v46 = vpop.f32.mrb[7].mxu1  ;;  %v3630_v43 = vpop.f32.mrb[5].mxu0 }
 0x17c   : > { %v5444_v14 = vadd.f32 %v3705_v46, %v3704_v33  ;;  %v3631_v38 = vadd.f32 %v3630_v43, %v3629_v41  ;;  %v3632_v37 = vpop.f32.mrb[6].mxu0 }
 0x17d   : > { %v3633_v7 = vpop.f32.mrb[7].mxu0 }
 0x17e   : > { %v3634_v61 = vadd.f32 %v3633_v7, %v3632_v37  ;;  %v2378_v53 = vadd.f32 %v3631_v38, %v5457_v1 }
 0x180   : > { %v3707_v40 = vpop.f32.mrb[8].mxu1  ;;  %v2381_v44 = vadd.f32 %v3634_v61, %v5457_v1 }
 0x181   : > { %v3708_v63 = vpop.f32.mrb[9].mxu1 }
 0x182   : > { %v5446_v0 = vadd.f32 %v3708_v63, %v3707_v40  ;;  %v3710_v5 = vpop.f32.mrb[10].mxu1  ;;  %v3635_v23 = vpop.f32.mrb[8].mxu0 }
 0x183   : > { %v3711_v13 = vpop.f32.mrb[11].mxu1  ;;  %v3636_v28 = vpop.f32.mrb[9].mxu0 }
 0x184   : > { %v5448_v31 = vadd.f32 %v3711_v13, %v3710_v5  ;;  %v3637_v36 = vadd.f32 %v3636_v28, %v3635_v23  ;;  %v3638_v50 = vpop.f32.mrb[10].mxu0 }
 0x185   : > { %v3639_v47 = vpop.f32.mrb[11].mxu0 }
 0x186   : > { %v3640_v39 = vadd.f32 %v3639_v47, %v3638_v50  ;;  %v2386_v38 = vadd.f32 %v3637_v36, %v5457_v1 }
 0x188   : > { %v3713_v55 = vpop.f32.mrb[12].mxu1  ;;  %v2389_v61 = vadd.f32 %v3640_v39, %v5457_v1 }
 0x189   : > { %v3714_v59 = vpop.f32.mrb[13].mxu1 }
 0x18a   : > { %v5450_v51 = vadd.f32 %v3714_v59, %v3713_v55  ;;  %v3716_v4 = vpop.f32.mrb[14].mxu1  ;;  %v3641_v15 = vpop.f32.mrb[12].mxu0 }
 0x18b   : > { %v3717_v45 = vpop.f32.mrb[15].mxu1  ;;  %v3642_v20 = vpop.f32.mrb[13].mxu0 }
 0x18c   : > { %v5452_v17 = vadd.f32 %v3717_v45, %v3716_v4  ;;  %v3643_v58 = vadd.f32 %v3642_v20, %v3641_v15  ;;  %v3644_v25 = vpop.f32.mrb[14].mxu0 }
 0x18d   : > { %v3645_v6 = vpop.f32.mrb[15].mxu0 }
 0x18e   : > { %v3646_v3 = vadd.f32 %v3645_v6, %v3644_v25  ;;  %v2394_v36 = vadd.f32 %v3643_v58, %v5457_v1 }
 0x190   : > { %v3735_v24 = vpop.f32.mrb[16].mxu1  ;;  %v2397_v39 = vadd.f32 %v3646_v3, %v5457_v1 }
 0x191   : > { %v3736_v10 = vpop.f32.mrb[17].mxu1 }
 0x192   : > { %v3737_v8 = vadd.f32 %v3736_v10, %v3735_v24  ;;  %v3738_v52 = vpop.f32.mrb[18].mxu1  ;;  %v3647_v62 = vpop.f32.mrb[16].mxu0 }
 0x193   : > { %v3739_v22 = vpop.f32.mrb[19].mxu1  ;;  %v3648_v54 = vpop.f32.mrb[17].mxu0 }
 0x194   : > { %v3740_v48 = vadd.f32 %v3739_v22, %v3738_v52  ;;  %v5461_v29 = vadd.f32 %v3737_v8, %v2370_v60  ;;  %v3649_v26 = vadd.f32 %v3648_v54, %v3647_v62  ;;  %v3650_v42 = vpop.f32.mrb[18].mxu0 }
 0x195   : > { %v3651_v12 = vpop.f32.mrb[19].mxu0 }
 0x196   : > { %v5463_v27 = vadd.f32 %v3740_v48, %v2373_v18  ;;  %v3652_v30 = vadd.f32 %v3651_v12, %v3650_v42  ;;  %v2402_v58 = vadd.f32 %v3649_v26, %v5457_v1 }
 0x198   : > { %v3741_v16 = vpop.f32.mrb[20].mxu1  ;;  %v2405_v3 = vadd.f32 %v3652_v30, %v5457_v1 }
 0x199   : > { %v3742_v2 = vpop.f32.mrb[21].mxu1 }
 0x19a   : > { %v3743_v35 = vadd.f32 %v3742_v2, %v3741_v16  ;;  %v3744_v56 = vpop.f32.mrb[22].mxu1  ;;  %v3653_v19 = vpop.f32.mrb[20].mxu0 }
 0x19b   : > { %v3745_v11 = vpop.f32.mrb[23].mxu1  ;;  %v3654_v9 = vpop.f32.mrb[21].mxu0 }
 0x19c   : > { %v3746_v21 = vadd.f32 %v3745_v11, %v3744_v56  ;;  %v5467_v34 = vadd.f32 %v3743_v35, %v2378_v53  ;;  %v3655_v33 = vadd.f32 %v3654_v9, %v3653_v19  ;;  %v3656_v46 = vpop.f32.mrb[22].mxu0 }
 0x19d   : > { %v3657_v43 = vpop.f32.mrb[23].mxu0 }
 0x19e   : > { %v5469_v41 = vadd.f32 %v3746_v21, %v2381_v44  ;;  %v3658_v37 = vadd.f32 %v3657_v43, %v3656_v46  ;;  %v2410_v26 = vadd.f32 %v3655_v33, %v5457_v1 }
 0x1a0   : > { %v3747_v7 = vpop.f32.mrb[24].mxu1  ;;  %v2413_v30 = vadd.f32 %v3658_v37, %v5457_v1 }
 0x1a1   : > { %v3748_v40 = vpop.f32.mrb[25].mxu1 }
 0x1a2   : > { %v3749_v63 = vadd.f32 %v3748_v40, %v3747_v7  ;;  %v3750_v5 = vpop.f32.mrb[26].mxu1  ;;  %v3659_v23 = vpop.f32.mrb[24].mxu0 }
 0x1a3   : > { %v3751_v13 = vpop.f32.mrb[27].mxu1  ;;  %v3660_v47 = vpop.f32.mrb[25].mxu0 }
 0x1a4   : > { %v3752_v28 = vadd.f32 %v3751_v13, %v3750_v5  ;;  %v5473_v50 = vadd.f32 %v3749_v63, %v2386_v38  ;;  %v3661_v55 = vadd.f32 %v3660_v47, %v3659_v23  ;;  %v3662_v59 = vpop.f32.mrb[26].mxu0 }
 0x1a5   : > { %v3663_v45 = vpop.f32.mrb[27].mxu0 }
 0x1a6   : > { %v5475_v4 = vadd.f32 %v3752_v28, %v2389_v61  ;;  %v3664_v15 = vadd.f32 %v3663_v45, %v3662_v59  ;;  %v2418_v33 = vadd.f32 %v3661_v55, %v5457_v1 }
 0x1a8   : > { %v3753_v20 = vpop.f32.mrb[28].mxu1  ;;  %v2421_v37 = vadd.f32 %v3664_v15, %v5457_v1 }
 0x1a9   : > { %v3754_v25 = vpop.f32.mrb[29].mxu1 }
 0x1aa   : > { %v3755_v6 = vadd.f32 %v3754_v25, %v3753_v20  ;;  %v3756_v24 = vpop.f32.mrb[30].mxu1  ;;  %v3665_v60 = vpop.f32.mrb[28].mxu0 }
 0x1ab   : > { %v3757_v10 = vpop.f32.mrb[31].mxu1  ;;  %v3666_v22 = vpop.f32.mrb[29].mxu0 }
 0x1ac   : > { %v3758_v8 = vadd.f32 %v3757_v10, %v3756_v24  ;;  %v5479_v52 = vadd.f32 %v3755_v6, %v2394_v36  ;;  %v3667_v18 = vadd.f32 %v3666_v22, %v3665_v60  ;;  %v3668_v48 = vpop.f32.mrb[30].mxu0 }
 0x1ad   : > { %v3669_v54 = vpop.f32.mrb[31].mxu0 }
 0x1ae   : > { %v5481_v62 = vadd.f32 %v3758_v8, %v2397_v39  ;;  %v3670_v42 = vadd.f32 %v3669_v54, %v3668_v48 }
 0x1b0   : > { %v3759_v12 = vpop.f32.mrb[32].mxu1 }
 0x1b1   : > { %v3760_v16 = vpop.f32.mrb[33].mxu1 }
 0x1b2   : > { %v3761_v2 = vadd.f32 %v3760_v16, %v3759_v12  ;;  %v3762_v53 = vpop.f32.mrb[34].mxu1  ;;  %v3671_v56 = vpop.f32.mrb[32].mxu0 }
 0x1b3   : > { %v3763_v35 = vpop.f32.mrb[35].mxu1  ;;  %v3672_v19 = vpop.f32.mrb[33].mxu0 }
 0x1b4   : > { %v3764_v11 = vadd.f32 %v3763_v35, %v3762_v53  ;;  %v5485_v44 = vadd.f32 %v3761_v2, %v2402_v58  ;;  %v3673_v21 = vadd.f32 %v3672_v19, %v3671_v56  ;;  %v3674_v9 = vpop.f32.mrb[34].mxu0  ;;  %v2429_v19 = vadd.f32 %v3670_v42, %v5457_v1 }
 0x1b5   : > { %v3675_v43 = vpop.f32.mrb[35].mxu0 }
 0x1b6   : > { %v5487_v46 = vadd.f32 %v3764_v11, %v2405_v3  ;;  %v3676_v7 = vadd.f32 %v3675_v43, %v3674_v9  ;;  %v2426_v3 = vadd.f32 %v3667_v18, %v5457_v1 }
 0x1b8   : > { %v3765_v40 = vpop.f32.mrb[36].mxu1 }
 0x1b9   : > { %v3766_v38 = vpop.f32.mrb[37].mxu1 }
 0x1ba   : > { %v3767_v63 = vadd.f32 %v3766_v38, %v3765_v40  ;;  %v3768_v5 = vpop.f32.mrb[38].mxu1  ;;  %v3677_v61 = vpop.f32.mrb[36].mxu0 }
 0x1bb   : > { %v3769_v13 = vpop.f32.mrb[39].mxu1  ;;  %v3678_v47 = vpop.f32.mrb[37].mxu0 }
 0x1bc   : > { %v3770_v23 = vadd.f32 %v3769_v13, %v3768_v5  ;;  %v5491_v28 = vadd.f32 %v3767_v63, %v2410_v26  ;;  %v3679_v59 = vadd.f32 %v3678_v47, %v3677_v61  ;;  %v3680_v45 = vpop.f32.mrb[38].mxu0 }
 0x1bd   : > { %v3681_v25 = vpop.f32.mrb[39].mxu0 }
 0x1be   : > { %v5493_v20 = vadd.f32 %v3770_v23, %v2413_v30  ;;  %v5495_v36 = vadd.f32 %v3681_v25, %v3680_v45  ;;  %v2434_v23 = vadd.f32 %v3673_v21, %v5457_v1  ;;  %v2437_v25 = vadd.f32 %v3676_v7, %v5457_v1 }
 0x1c0   : > { %v3771_v6 = vpop.f32.mrb[40].mxu1 }
 0x1c1   : > { %v3772_v24 = vpop.f32.mrb[41].mxu1 }
 0x1c2   : > { %v3773_v10 = vadd.f32 %v3772_v24, %v3771_v6  ;;  %v3774_v39 = vpop.f32.mrb[42].mxu1  ;;  %v3683_v8 = vpop.f32.mrb[40].mxu0 }
 0x1c3   : > { %v3775_v60 = vpop.f32.mrb[43].mxu1  ;;  %v3684_v54 = vpop.f32.mrb[41].mxu0 }
 0x1c4   : > { %v3776_v22 = vadd.f32 %v3775_v60, %v3774_v39  ;;  %v5499_v48 = vadd.f32 %v3773_v10, %v2418_v33  ;;  %v5501_v12 = vadd.f32 %v3684_v54, %v3683_v8  ;;  %v3686_v16 = vpop.f32.mrb[42].mxu0 }
 0x1c5   : > { %v3687_v2 = vpop.f32.mrb[43].mxu0 }
 0x1c6   : > { %v5503_v58 = vadd.f32 %v3776_v22, %v2421_v37  ;;  %v5505_v53 = vadd.f32 %v3687_v2, %v3686_v16 }
 0x1c8   : > { %v3777_v35 = vpop.f32.mrb[44].mxu1 }
 0x1c9   : > { %v3778_v55 = vpop.f32.mrb[45].mxu1 }
 0x1ca   : > { %v3779_v56 = vadd.f32 %v3778_v55, %v3777_v35  ;;  %v3780_v11 = vpop.f32.mrb[46].mxu1  ;;  %v3689_v9 = vpop.f32.mrb[44].mxu0  ;;  %v2442_v55 = vadd.f32 %v3679_v59, %v5457_v1 }
 0x1cb   : > { %v3781_v15 = vpop.f32.mrb[47].mxu1  ;;  %v3690_v38 = vpop.f32.mrb[45].mxu0 }
 0x1cc   : > { %v3782_v43 = vadd.f32 %v3781_v15, %v3780_v11  ;;  %v5509_v40 = vadd.f32 %v3779_v56, %v2426_v3  ;;  %v5511_v26 = vadd.f32 %v3690_v38, %v3689_v9  ;;  %v3692_v63 = vpop.f32.mrb[46].mxu0 }
 0x1cd   : > { %v3693_v13 = vpop.f32.mrb[47].mxu0 }
 0x1ce   : > { %v5513_v5 = vadd.f32 %v3782_v43, %v2429_v19  ;;  %v5515_v30 = vadd.f32 %v3693_v13, %v3692_v63  ;;  %v2445_v19 = vadd.f32 %v5495_v36, %v5457_v1 }
 0x1d0   : > { %v3783_v18 = vpop.f32.mrb[48].mxu1 }
 0x1d1   : > { %v3784_v61 = vpop.f32.mrb[49].mxu1 }
 0x1d2   : > { %v3785_v42 = vadd.f32 %v3784_v61, %v3783_v18  ;;  %v3786_v47 = vpop.f32.mrb[50].mxu1  ;;  %v3861_v6 = vpop.f32.mrb[48].mxu0 }
 0x1d3   : > { %v3787_v45 = vpop.f32.mrb[51].mxu1  ;;  %v2700_v10 = vadd.f32 %v3861_v6, %v5467_v34  ;;  %v2691_v39 = vpop.f32.mrb[49].mxu0 }
 0x1d4   : > { %v3788_v24 = vadd.f32 %v3787_v45, %v3786_v47  ;;  %v5520_v33 = vadd.f32 %v3785_v42, %v2434_v23  ;;  %v2692_v60 = vadd.f32 %v2691_v39, %v5461_v29  ;;  %v3862_v37 = vpop.f32.mrb[50].mxu0 }
 0x1d5   : > { %v2703_v21 = vadd.f32 %v3862_v37, %v5469_v41  ;;  %v2694_v22 = vpop.f32.mrb[51].mxu0  ;;  %v2820_v16 = vmax.f32 %v2700_v10, 0.0 }
 0x1d6   : > { %v5524_v8 = vadd.f32 %v3788_v24, %v2437_v25  ;;  %v2695_v7 = vadd.f32 %v2694_v22, %v5463_v27  ;;  %v2818_v34 = vmax.f32 %v2692_v60, 0.0 }
 0x1d7   : > { %v2821_v2 = vmax.f32 %v2703_v21, 0.0 }
 0x1d8   : > { %v3789_v54 = vpop.f32.mrb[52].mxu1  ;;  %v2819_v3 = vmax.f32 %v2695_v7, 0.0 }
 0x1d9   : > { %v3790_v35 = vpop.f32.mrb[53].mxu1  ;;  %v3520_v11 = vpack.c.bf16 %v2821_v2, %v2820_v16 }
 0x1da   : > { %v3791_v56 = vadd.f32 %v3790_v35, %v3789_v54  ;;  %v3792_v29 = vpop.f32.mrb[54].mxu1  ;;  %v3515_v9 = vpack.c.bf16 %v2819_v3, %v2818_v34  ;;  %v3865_v41 = vpop.f32.mrb[52].mxu0 }
 0x1db   : > { %v3793_v15 = vpop.f32.mrb[55].mxu1  ;;  %3592 = vst [vmem:[%s5535_s30 + $0x8] sm:$0xff] %v3520_v11   ;;  %v2716_v27 = vadd.f32 %v3865_v41, %v5479_v52  ;;  %v2707_v59 = vpop.f32.mrb[53].mxu0  ;;  %v2450_v52 = vadd.f32 %v5501_v12, %v5457_v1 }
 0x1dc   : > { %v3794_v43 = vadd.f32 %v3793_v15, %v3792_v29  ;;  %v5533_v38 = vadd.f32 %v3791_v56, %v2442_v55  ;;  %3516 = vst [vmem:[%s5535_s30] sm:$0xff] %v3515_v9   ;;  %v2708_v63 = vadd.f32 %v2707_v59, %v5473_v50  ;;  %v3866_v13 = vpop.f32.mrb[54].mxu0 }
 0x1dd   : > { %v2719_v36 = vadd.f32 %v3866_v13, %v5481_v62  ;;  %v2710_v61 = vpop.f32.mrb[55].mxu0  ;;  %v2824_v47 = vmax.f32 %v2716_v27, 0.0  ;;  %v2453_v62 = vadd.f32 %v5505_v53, %v5457_v1 }
 0x1de   : > { %v5541_v18 = vadd.f32 %v3794_v43, %v2445_v19  ;;  %v2711_v23 = vadd.f32 %v2710_v61, %v5475_v4  ;;  %v2822_v6 = vmax.f32 %v2708_v63, 0.0 }
 0x1df   : > { %v2825_v45 = vmax.f32 %v2719_v36, 0.0 }
 0x1e0   : > { %v3795_v42 = vpop.f32.mrb[56].mxu1  ;;  %v2823_v24 = vmax.f32 %v2711_v23, 0.0 }
 0x1e1   : > { %v3796_v25 = vpop.f32.mrb[57].mxu1  ;;  %v3530_v39 = vpack.c.bf16 %v2825_v45, %v2824_v47 }
 0x1e2   : > { %v3797_v50 = vadd.f32 %v3796_v25, %v3795_v42  ;;  %v3798_v10 = vpop.f32.mrb[58].mxu1  ;;  %v3525_v37 = vpack.c.bf16 %v2823_v24, %v2822_v6  ;;  %v3869_v4 = vpop.f32.mrb[56].mxu0 }
 0x1e3   : > { %v3799_v60 = vpop.f32.mrb[59].mxu1  ;;  %3594 = vst [vmem:[%s5535_s30 + $0x18] sm:$0xff] %v3530_v39   ;;  %v2732_v7 = vadd.f32 %v3869_v4, %v5491_v28  ;;  %v2723_v54 = vpop.f32.mrb[57].mxu0  ;;  %v2458_v28 = vadd.f32 %v5511_v26, %v5457_v1 }
 0x1e4   : > { %v3800_v21 = vadd.f32 %v3799_v60, %v3798_v10  ;;  %v5549_v22 = vadd.f32 %v3797_v50, %v2450_v52  ;;  %3593 = vst [vmem:[%s5535_s30 + $0x10] sm:$0xff] %v3525_v37   ;;  %v2724_v12 = vadd.f32 %v2723_v54, %v5485_v44  ;;  %v3870_v16 = vpop.f32.mrb[58].mxu0 }
 0x1e5   : > { %v2735_v35 = vadd.f32 %v3870_v16, %v5493_v20  ;;  %v2726_v55 = vpop.f32.mrb[59].mxu0  ;;  %v2828_v3 = vmax.f32 %v2732_v7, 0.0  ;;  %v2461_v20 = vadd.f32 %v5515_v30, %v5457_v1 }
 0x1e6   : > { %v5555_v2 = vadd.f32 %v3800_v21, %v2453_v62  ;;  %v2727_v53 = vadd.f32 %v2726_v55, %v5487_v46  ;;  %v2826_v11 = vmax.f32 %v2724_v12, 0.0 }
 0x1e7   : > { %v2829_v56 = vmax.f32 %v2735_v35, 0.0 }
 0x1e8   : > { %v3801_v34 = vpop.f32.mrb[60].mxu1  ;;  %v2827_v15 = vmax.f32 %v2727_v53, 0.0 }
 0x1e9   : > { %v3802_v29 = vpop.f32.mrb[61].mxu1  ;;  %v3540_v9 = vpack.c.bf16 %v2829_v56, %v2828_v3 }
 0x1ea   : > { %v3803_v44 = vadd.f32 %v3802_v29, %v3801_v34  ;;  %v3804_v19 = vpop.f32.mrb[62].mxu1  ;;  %v3535_v43 = vpack.c.bf16 %v2827_v15, %v2826_v11  ;;  %v3873_v46 = vpop.f32.mrb[60].mxu0 }
 0x1eb   : > { %v3805_v41 = vpop.f32.mrb[63].mxu1  ;;  %3596 = vst [vmem:[%s5535_s30 + $0x28] sm:$0xff] %v3540_v9   ;;  %v2748_v63 = vadd.f32 %v3873_v46, %v5509_v40  ;;  %v2739_v13 = vpop.f32.mrb[61].mxu0  ;;  %v2466_v40 = vadd.f32 %v5438_v49, %v5457_v1 }
 0x1ec   : > { %v3806_v27 = vadd.f32 %v3805_v41, %v3804_v19  ;;  %v2619_v59 = vadd.f32 %v3803_v44, %v2458_v28  ;;  %3595 = vst [vmem:[%s5535_s30 + $0x20] sm:$0xff] %v3535_v43   ;;  %v2740_v26 = vadd.f32 %v2739_v13, %v5499_v48  ;;  %v3874_v36 = vpop.f32.mrb[62].mxu0 }
 0x1ed   : > { %v2751_v23 = vadd.f32 %v3874_v36, %v5513_v5  ;;  %v2742_v42 = vpop.f32.mrb[63].mxu0  ;;  %v2832_v30 = vmax.f32 %v2748_v63, 0.0  ;;  %v2469_v5 = vadd.f32 %v5440_v32, %v5457_v1 }
 0x1ee   : > { %v2622_v61 = vadd.f32 %v3806_v27, %v2461_v20  ;;  %v2743_v47 = vadd.f32 %v2742_v42, %v5503_v58  ;;  %v2830_v6 = vmax.f32 %v2740_v26, 0.0 }
 0x1ef   : > { %v2833_v25 = vmax.f32 %v2751_v23, 0.0  ;;  %v2482_v23 = vadd.f32 %v5446_v0, %v5457_v1 }
 0x1f0   : > { %v3807_v45 = vpop.f32.mrb[64].mxu1  ;;  %v2831_v24 = vmax.f32 %v2743_v47, 0.0 }
 0x1f1   : > { %v3808_v52 = vpop.f32.mrb[65].mxu1  ;;  %v3550_v10 = vpack.c.bf16 %v2833_v25, %v2832_v30 }
 0x1f2   : > { %v3809_v50 = vadd.f32 %v3808_v52, %v3807_v45  ;;  %v3810_v48 = vpop.f32.mrb[66].mxu1  ;;  %v3545_v60 = vpack.c.bf16 %v2831_v24, %v2830_v6  ;;  %v3877_v58 = vpop.f32.mrb[64].mxu0 }
 0x1f3   : > { %v3811_v39 = vpop.f32.mrb[67].mxu1  ;;  %3598 = vst [vmem:[%s5535_s30 + $0x38] sm:$0xff] %v3550_v10   ;;  %v2764_v4 = vadd.f32 %v3877_v58, %v5533_v38  ;;  %v2755_v21 = vpop.f32.mrb[65].mxu0  ;;  %v2474_v38 = vadd.f32 %v5442_v57, %v5457_v1 }
 0x1f4   : > { %v3812_v62 = vadd.f32 %v3811_v39, %v3810_v48  ;;  %v2627_v37 = vadd.f32 %v3809_v50, %v2466_v40  ;;  %3597 = vst [vmem:[%s5535_s30 + $0x30] sm:$0xff] %v3545_v60   ;;  %v2756_v49 = vadd.f32 %v2755_v21, %v5520_v33  ;;  %v3878_v7 = vpop.f32.mrb[66].mxu0 }
 0x1f5   : > { %v2767_v12 = vadd.f32 %v3878_v7, %v5541_v18  ;;  %v2758_v16 = vpop.f32.mrb[67].mxu0  ;;  %v2836_v32 = vmax.f32 %v2764_v4, 0.0  ;;  %v2477_v18 = vadd.f32 %v5444_v14, %v5457_v1  ;;  %v2490_v4 = vadd.f32 %v5450_v51, %v5457_v1 }
 0x1f6   : > { %v2630_v54 = vadd.f32 %v3812_v62, %v2469_v5  ;;  %v2759_v35 = vadd.f32 %v2758_v16, %v5524_v8  ;;  %v2834_v3 = vmax.f32 %v2756_v49, 0.0 }
 0x1f7   : > { %v2837_v53 = vmax.f32 %v2767_v12, 0.0 }
 0x1f8   : > { %v3813_v55 = vpop.f32.mrb[68].mxu1  ;;  %v2835_v56 = vmax.f32 %v2759_v35, 0.0  ;;  %v2493_v35 = vadd.f32 %v5452_v17, %v5457_v1 }
 0x1f9   : > { %v3814_v34 = vpop.f32.mrb[69].mxu1  ;;  %v3560_v28 = vpack.c.bf16 %v2837_v53, %v2836_v32 }
 0x1fa   : > { %v3815_v29 = vadd.f32 %v3814_v34, %v3813_v55  ;;  %v3816_v33 = vpop.f32.mrb[70].mxu1  ;;  %v3555_v15 = vpack.c.bf16 %v2835_v56, %v2834_v3  ;;  %v3881_v8 = vpop.f32.mrb[68].mxu0 }
 0x1fb   : > { %v3817_v11 = vpop.f32.mrb[71].mxu1  ;;  %3600 = vst [vmem:[%s5535_s30 + $0x48] sm:$0xff] %v3560_v28   ;;  %v2780_v9 = vadd.f32 %v3881_v8, %v2619_v59  ;;  %v2771_v41 = vpop.f32.mrb[69].mxu0 }
 0x1fc   : > { %v3818_v44 = vadd.f32 %v3817_v11, %v3816_v33  ;;  %v2635_v19 = vadd.f32 %v3815_v29, %v2474_v38  ;;  %3599 = vst [vmem:[%s5535_s30 + $0x40] sm:$0xff] %v3555_v15   ;;  %v2772_v20 = vadd.f32 %v2771_v41, %v5549_v22  ;;  %v3882_v57 = vpop.f32.mrb[70].mxu0 }
 0x1fd   : > { %v2783_v46 = vadd.f32 %v3882_v57, %v2622_v61  ;;  %v2774_v27 = vpop.f32.mrb[71].mxu0  ;;  %v2840_v26 = vmax.f32 %v2780_v9, 0.0  ;;  %v2485_v61 = vadd.f32 %v5448_v31, %v5457_v1 }
 0x1fe   : > { %v2638_v43 = vadd.f32 %v3818_v44, %v2477_v18  ;;  %v2775_v63 = vadd.f32 %v2774_v27, %v5555_v2  ;;  %v2838_v59 = vmax.f32 %v2772_v20, 0.0 }
 0x1ff   : > { %v2841_v14 = vmax.f32 %v2783_v46, 0.0 }
 0x200   : > { %v3819_v13 = vpop.f32.mrb[72].mxu1  ;;  %v2839_v42 = vmax.f32 %v2775_v63, 0.0 }
 0x201   : > { %v3820_v36 = vpop.f32.mrb[73].mxu1  ;;  %v3570_v22 = vpack.c.bf16 %v2841_v14, %v2840_v26 }
 0x202   : > { %v3821_v47 = vadd.f32 %v3820_v36, %v3819_v13  ;;  %v3822_v45 = vpop.f32.mrb[74].mxu1  ;;  %v3565_v25 = vpack.c.bf16 %v2839_v42, %v2838_v59  ;;  %v3885_v2 = vpop.f32.mrb[72].mxu0 }
 0x203   : > { %v3823_v30 = vpop.f32.mrb[75].mxu1  ;;  %3602 = vst [vmem:[%s5535_s30 + $0x58] sm:$0xff] %v3570_v22   ;;  %v2796_v6 = vadd.f32 %v3885_v2, %v2635_v19  ;;  %v2787_v24 = vpop.f32.mrb[73].mxu0 }
 0x204   : > { %v3824_v52 = vadd.f32 %v3823_v30, %v3822_v45  ;;  %v2643_v40 = vadd.f32 %v3821_v47, %v2482_v23  ;;  %3601 = vst [vmem:[%s5535_s30 + $0x50] sm:$0xff] %v3565_v25   ;;  %v2788_v50 = vadd.f32 %v2787_v24, %v2627_v37  ;;  %v3886_v48 = vpop.f32.mrb[74].mxu0 }
 0x205   : > { %v2799_v10 = vadd.f32 %v3886_v48, %v2638_v43  ;;  %v2790_v39 = vpop.f32.mrb[75].mxu0  ;;  %v2844_v58 = vmax.f32 %v2796_v6, 0.0 }
 0x206   : > { %v2646_v0 = vadd.f32 %v3824_v52, %v2485_v61  ;;  %v2791_v5 = vadd.f32 %v2790_v39, %v2630_v54  ;;  %v2842_v21 = vmax.f32 %v2788_v50, 0.0 }
 0x207   : > { %v2845_v62 = vmax.f32 %v2799_v10, 0.0 }
 0x208   : > { %v3825_v60 = vpop.f32.mrb[76].mxu1  ;;  %v2843_v49 = vmax.f32 %v2791_v5, 0.0 }
 0x209   : > { %v3826_v31 = vpop.f32.mrb[77].mxu1  ;;  %v3580_v16 = vpack.c.bf16 %v2845_v62, %v2844_v58 }
 0x20a   : > { %v3827_v7 = vadd.f32 %v3826_v31, %v3825_v60  ;;  %v3828_v12 = vpop.f32.mrb[78].mxu1  ;;  %v3575_v54 = vpack.c.bf16 %v2843_v49, %v2842_v21  ;;  %v3889_v32 = vpop.f32.mrb[76].mxu0 }
 0x20b   : > { %v3829_v37 = vpop.f32.mrb[79].mxu1  ;;  %3604 = vst [vmem:[%s5535_s30 + $0x68] sm:$0xff] %v3580_v16   ;;  %v2803_v34 = vpop.f32.mrb[77].mxu0 }
 0x20c   : > { %v2651_v55 = vadd.f32 %v3827_v7, %v2490_v4  ;;  %v3830_v53 = vadd.f32 %v3829_v37, %v3828_v12  ;;  %3603 = vst [vmem:[%s5535_s30 + $0x60] sm:$0xff] %v3575_v54   ;;  %v2804_v51 = vadd.f32 %v2803_v34, %v2643_v40  ;;  %v3890_v56 = vpop.f32.mrb[78].mxu0 }
 0x20d   : > { %v2806_v29 = vpop.f32.mrb[79].mxu0 }
 0x20e   : > { %v2812_v38 = vadd.f32 %v3889_v32, %v2651_v55  ;;  %v2654_v3 = vadd.f32 %v3830_v53, %v2493_v35  ;;  %v2807_v28 = vadd.f32 %v2806_v29, %v2646_v0  ;;  %v2846_v1 = vmax.f32 %v2804_v51, 0.0 }
 0x210   : > { %v2815_v33 = vadd.f32 %v3890_v56, %v2654_v3  ;;  %v2848_v17 = vmax.f32 %v2812_v38, 0.0  ;;  %v2847_v18 = vmax.f32 %v2807_v28, 0.0 }
 0x212   : > { %v2849_v11 = vmax.f32 %v2815_v33, 0.0  ;;  %v3585_v8 = vpack.c.bf16 %v2847_v18, %v2846_v1 }
 0x214   : > { %v3590_v15 = vpack.c.bf16 %v2849_v11, %v2848_v17  ;;  %3605 = vst [vmem:[%s5535_s30 + $0x70] sm:$0xff] %v3585_v8  }
 0x216   : > { %3606 = vst [vmem:[%s5535_s30 + $0x78] sm:$0xff] %v3590_v15  }
 0x217   : > { %4224 = shalt.err (!%p4221_p5)
}
 0x218   : > { %s4225_s21 = scalar_lea.hbm %s5604_s8, 2048  ;;  %s4229_s27 = scalar_lea.hbm %s5663_s3, 4096 }
 0x219   : > { %p4226_p6 = scmp.ne.s32.totalorder %s5604_s8, %s4225_s21  ;;  %p4230_p10 = scmp.lt.u32.totalorder %s5604_s8, %s5663_s3 }
 0x21a   : > { %p4231_p11 = scmp.lt.u32.totalorder %s4229_s27, %s4225_s21  ;;  %p4233_p13 = scmp.lt.u32.totalorder %s4225_s21, %s5604_s8 }
 0x21b   : > { %p4227_p7 = pnand %p4226_p6, %p4354_p4 }
 0x21c   : > { %p4232_p12 = por %p4231_p11, %p4230_p10 }
 0x21d   : > { %p4228_p9 = pneg %p4227_p7 }
 0x21e   : > { %p4234_p0 = por %p4233_p13, %p4232_p12 }
 0x220   : > { %p4235_p1 = pnand %p4234_p0, %p4228_p9 }
 0x222   : > { %4238 = shalt.err (!%p4235_p1)
}
 0x223   : > { %s4293_s30 = smov 4  }
 0x224   : > { %3908 = dma.vmem_to_hbm [thread:$0]  (%p4354_p4), %s5606_s5, 2048, %s5604_s8, %s5612_s15, %s4291_s26, %s4291_s26, %s4293_s30  }
 0x225 PF: > { %p3914_p2 = scmp.ge.s32.totalorder %s4289_s17, 2  ;;  %s3042_s4 = sand.u32 1, %s4269_s12  }
 0x226   : > { %s3043_s6 = scalar_lea.sflag [#allocation3], %s3042_s4 }
 0x227   : > { %p3911_p3 = pnand %p3914_p2, %p4361_p8 }
 0x229   : > { %4264 = dma.done.wait (!%p3911_p3), %s3043_s6, 2048  }
 0x22a   : > { %4266 = vsyncadd (!%p3911_p3), %s3043_s6, 4294965248  ;;  %s16_s17 = sadd.s32 1, %s4289_s17   ;;  %s5734_s12 = smov %s4273_s13 }
 0x22b   : > { %p13_p5 = scmp.ge.s32.totalorder %s16_s17, 4   ;;  %s5735_s13 = smov %s4277_s14 }
 0x22c   : > { %s5736_s14 = smov %s4367_s25  ;;  %s5737_s15 = smov %s4285_s16 }
 0x22d   : > { %s5738_s16 = smov %s5740_s20  ;;  %15 = sbr.rel (!%p13_p5) target bundleno = 4 (0x4), region = 70 }
 0x234   :  { %3048 = vsyncpa [#allocation3], 1 }
 0x235   :  { %3050 = vsyncpa [#allocation3 + $0x1], 1 }

</bundles_post_ra>
